<compile_context>
chip_gen: v6e
topology: v6e:2x2x1
jax: 0.10.0
libtpu: 0.0.40
codegen_flags: <defaults>
</compile_context>

<pallas_src>
import math
import numpy as np
import jax
import jax.numpy as jnp
from jax.experimental import pallas as pl
from jax.experimental.pallas import tpu as pltpu


# ----------------------------- model / problem sizes -----------------------------
B = 2            # batch
STATE_DIM = 16
ACTION_DIM = 8
T_DIM = 16       # time-embedding dim
HIDDEN = 32      # denoiser MLP hidden
N_TIMESTEPS = 10
MAX_ACTION = 1.0

LANES = 128


def _rpad(r):
    return ((r + 7) // 8) * 8


# -------- constant slab layout (weights / biases / time-projection table) --------
OFF_TPROJ = 0                                   # (n, HIDDEN)  time-mlp@w1t + b1
OFF_W1X = OFF_TPROJ + _rpad(N_TIMESTEPS)        # (ACTION_DIM, HIDDEN)
OFF_W1S = OFF_W1X + _rpad(ACTION_DIM)           # (STATE_DIM, HIDDEN)
OFF_W2 = OFF_W1S + _rpad(STATE_DIM)             # (HIDDEN, HIDDEN)
OFF_B2 = OFF_W2 + _rpad(HIDDEN)                 # (1, HIDDEN)
OFF_W3 = OFF_B2 + 8                             # (HIDDEN, HIDDEN)
OFF_B3 = OFF_W3 + _rpad(HIDDEN)                 # (1, HIDDEN)
OFF_WF = OFF_B3 + 8                             # (HIDDEN, ACTION_DIM)
OFF_BF = OFF_WF + _rpad(HIDDEN)                 # (1, ACTION_DIM)
CONST_ROWS = OFF_BF + 8

# --------------------- per-call data slab layout (x, state, noise) ----------------
OFF_X = 0                                       # (B, ACTION_DIM)
OFF_S = 8                                       # (B, STATE_DIM)
OFF_N = 16                                      # step s at rows OFF_N + 8*s
DATA_ROWS = OFF_N + 8 * N_TIMESTEPS


# ------------------------------- activation helpers -------------------------------
def _softplus_ref(v):
    return jnp.maximum(v, 0.0) + jnp.log1p(jnp.exp(-jnp.abs(v)))


def _mish_ref(v):
    # exact mish (used on host for the time-MLP table and the pure-JAX reference)
    return v * jnp.tanh(_softplus_ref(v))


def _mish_fast(v):
    # mish(x) = x * tanh(log(1+e^x)) = x - 2x / ((1+e^x)^2 + 1)
    # single exp + approx reciprocal (EUP); pre-clamp for overflow safety.
    e = jnp.exp(jnp.minimum(v, 20.0))
    u = 1.0 + e
    return v - 2.0 * v * pl.reciprocal(u * u + 1.0, approx=True)


# ----------------------------------- kernel ---------------------------------------
def _make_kernel(n_timesteps, max_action, src, srm1, c1, c2):
    n = int(n_timesteps)
    # schedule coefficients baked in as Python float constants
    src = tuple(float(v) for v in src)
    srm1 = tuple(float(v) for v in srm1)
    c1 = tuple(float(v) for v in c1)
    c2 = tuple(float(v) for v in c2)

    def kernel(const_ref, data_ref, out_ref):
        bf16 = jnp.bfloat16

        # ---- static carve-outs of the constant slab (once) ----
        w1x = const_ref[OFF_W1X:OFF_W1X + ACTION_DIM, 0:HIDDEN].astype(bf16)
        w1s = const_ref[OFF_W1S:OFF_W1S + STATE_DIM, 0:HIDDEN].astype(bf16)
        w2 = const_ref[OFF_W2:OFF_W2 + HIDDEN, 0:HIDDEN].astype(bf16)
        b2 = const_ref[OFF_B2:OFF_B2 + 1, 0:HIDDEN]
        w3 = const_ref[OFF_W3:OFF_W3 + HIDDEN, 0:HIDDEN].astype(bf16)
        b3 = const_ref[OFF_B3:OFF_B3 + 1, 0:HIDDEN]
        wf = const_ref[OFF_WF:OFF_WF + HIDDEN, 0:ACTION_DIM].astype(bf16)
        bf_ = const_ref[OFF_BF:OFF_BF + 1, 0:ACTION_DIM]

        # ---- loop-invariant work ----
        x = data_ref[OFF_X:OFF_X + B, 0:ACTION_DIM]                        # f32 (B, A)
        state_bf = data_ref[OFF_S:OFF_S + B, 0:STATE_DIM].astype(bf16)
        s_proj = jnp.dot(state_bf, w1s, preferred_element_type=jnp.float32)  # (B, H)

        # ---- fully static, unrolled reverse-diffusion loop ----
        for step in range(n):
            i = n - 1 - step                                               # reversed timestep

            # denoiser MLP: concat([x, t, state]) @ W1 done as split matmuls;
            # tproj row already contains (time_mlp(emb_i) @ w1t + b1).
            tproj = const_ref[OFF_TPROJ + i:OFF_TPROJ + i + 1, 0:HIDDEN]   # (1, H)
            h = _mish_fast(
                jnp.dot(x.astype(bf16), w1x, preferred_element_type=jnp.float32)
                + tproj + s_proj)
            h = _mish_fast(
                jnp.dot(h.astype(bf16), w2, preferred_element_type=jnp.float32) + b2)
            h = _mish_fast(
                jnp.dot(h.astype(bf16), w3, preferred_element_type=jnp.float32) + b3)
            eps = jnp.dot(h.astype(bf16), wf, preferred_element_type=jnp.float32) + bf_

            # p_mean_variance / q_posterior / p_sample (std already folded into noise)
            x_recon = jnp.clip(src[i] * x - srm1[i] * eps, -max_action, max_action)
            mean = c1[i] * x_recon + c2[i] * x
            r0 = OFF_N + 8 * step
            x = mean + data_ref[r0:r0 + B, 0:ACTION_DIM]

        out_ref[...] = jnp.clip(x, -max_action, max_action)               # final .clamp_

    return kernel


# ---------------------------------- host-side prep ---------------------------------
def prepare_constants(params, emb_table):
    """One-time constant slab: time-MLP projection table (b1 folded) + weights."""
    emb = emb_table.reshape(N_TIMESTEPS, T_DIM)
    th = _mish_ref(emb @ params["tw1"] + params["tb1"])
    t_feat = th @ params["tw2"] + params["tb2"]                           # (n, T_DIM)
    tproj = t_feat @ params["w1t"] + params["b1"]                         # (n, HIDDEN)

    slab = jnp.zeros((CONST_ROWS, LANES), jnp.float32)

    def put(s, off, a):
        a = jnp.asarray(a, jnp.float32)
        return s.at[off:off + a.shape[0], :a.shape[1]].set(a)

    slab = put(slab, OFF_TPROJ, tproj)
    slab = put(slab, OFF_W1X, params["w1x"])
    slab = put(slab, OFF_W1S, params["w1s"])
    slab = put(slab, OFF_W2, params["w2"])
    slab = put(slab, OFF_B2, params["b2"])
    slab = put(slab, OFF_W3, params["w3"])
    slab = put(slab, OFF_B3, params["b3"])
    slab = put(slab, OFF_WF, params["wf"])
    slab = put(slab, OFF_BF, params["bf"])
    return jax.block_until_ready(slab)


def make_sampler(sched, n_timesteps=N_TIMESTEPS, max_action=MAX_ACTION):
    kernel = _make_kernel(n_timesteps, max_action,
                          sched["src"], sched["srm1"], sched["c1"], sched["c2"])
    # per-step std, indexed by step (reversed timestep order)
    std_rev = jnp.asarray(np.ascontiguousarray(sched["std"][::-1]), jnp.float32)

    vmem = pl.BlockSpec(memory_space=pltpu.MemorySpace.VMEM)
    pallas_fn = pl.pallas_call(
        kernel,
        out_shape=jax.ShapeDtypeStruct((B, ACTION_DIM), jnp.float32),
        in_specs=[vmem, vmem],
        out_specs=vmem,
    )

    @jax.jit
    def sample(const_slab, state, x_init, noise_steps):
        # pre-scale noise by (i>0)*exp(0.5*posterior_log_var) and pack the data slab
        noise_scaled = noise_steps * std_rev[:, None, None]               # (n, B, A)
        noise_block = jnp.zeros((n_timesteps, 8, LANES), jnp.float32)
        noise_block = noise_block.at[:, :B, :ACTION_DIM].set(noise_scaled)

        data = jnp.zeros((DATA_ROWS, LANES), jnp.float32)
        data = data.at[OFF_X:OFF_X + B, :ACTION_DIM].set(x_init)
        data = data.at[OFF_S:OFF_S + B, :STATE_DIM].set(state)
        data = data.at[OFF_N:, :].set(noise_block.reshape(n_timesteps * 8, LANES))

        return pallas_fn(const_slab, data)

    return sample


# ------------------------------ pure-JAX reference --------------------------------
def reference_sample(state, x_init, noise_steps, emb_table, sched, params,
                     n_timesteps=N_TIMESTEPS, max_action=MAX_ACTION):
    def model(x, i, s):
        emb = emb_table[i]                                                # (1, T_DIM)
        th = _mish_ref(emb @ params["tw1"] + params["tb1"])
        t_feat = th @ params["tw2"] + params["tb2"]
        h = _mish_ref(x @ params["w1x"] + t_feat @ params["w1t"]
                      + s @ params["w1s"] + params["b1"])
        h = _mish_ref(h @ params["w2"] + params["b2"])
        h = _mish_ref(h @ params["w3"] + params["b3"])
        return h @ params["wf"] + params["bf"]

    x = x_init
    for step in range(n_timesteps):
        i = n_timesteps - 1 - step
        eps = model(x, i, state)
        x_recon = jnp.clip(float(sched["src"][i]) * x - float(sched["srm1"][i]) * eps,
                           -max_action, max_action)
        mean = float(sched["c1"][i]) * x_recon + float(sched["c2"][i]) * x
        nz = 0.0 if i == 0 else 1.0
        x = mean + nz * math.exp(0.5 * float(sched["plv"][i])) * noise_steps[step]
    return jnp.clip(x, -max_action, max_action)


# ------------------------------------- setup ---------------------------------------
def make_schedule(n_timesteps):
    betas = np.linspace(1e-4, 2e-2, n_timesteps, dtype=np.float32)        # linear schedule
    alphas = (1.0 - betas).astype(np.float32)
    acp = np.cumprod(alphas).astype(np.float32)
    acp_prev = np.concatenate([np.ones((1,), np.float32), acp[:-1]])
    post_var = betas * (1.0 - acp_prev) / (1.0 - acp)
    plv = np.log(np.maximum(post_var, 1e-20)).astype(np.float32)
    nonzero = (np.arange(n_timesteps) > 0).astype(np.float32)
    return {
        "src": np.sqrt(1.0 / acp).astype(np.float32),
        "srm1": np.sqrt(1.0 / acp - 1.0).astype(np.float32),
        "c1": (betas * np.sqrt(acp_prev) / (1.0 - acp)).astype(np.float32),
        "c2": ((1.0 - acp_prev) * np.sqrt(alphas) / (1.0 - acp)).astype(np.float32),
        "plv": plv,
        "std": (nonzero * np.exp(0.5 * plv)).astype(np.float32),
    }


def make_sinusoidal_table(n_timesteps, t_dim):
    half = t_dim // 2
    freqs = jnp.exp(jnp.arange(half, dtype=jnp.float32)
                    * -(math.log(10000.0) / (half - 1)))
    args = jnp.arange(n_timesteps, dtype=jnp.float32)[:, None] * freqs[None, :]
    emb = jnp.concatenate([jnp.sin(args), jnp.cos(args)], axis=-1)        # (n, t_dim)
    return emb.reshape(n_timesteps, 1, t_dim).astype(jnp.float32)


def make_params(key):
    ks = jax.random.split(key, 14)
    w = lambda k, shape: (0.1 * jax.random.normal(k, shape)).astype(jnp.float32)
    bias = lambda k, n: (0.01 * jax.random.normal(k, (1, n))).astype(jnp.float32)
    return {
        "tw1": w(ks[0], (T_DIM, 2 * T_DIM)), "tb1": bias(ks[1], 2 * T_DIM),
        "tw2": w(ks[2], (2 * T_DIM, T_DIM)), "tb2": bias(ks[3], T_DIM),
        "w1x": w(ks[4], (ACTION_DIM, HIDDEN)),
        "w1t": w(ks[5], (T_DIM, HIDDEN)),
        "w1s": w(ks[6], (STATE_DIM, HIDDEN)),
        "b1": bias(ks[7], HIDDEN),
        "w2": w(ks[8], (HIDDEN, HIDDEN)), "b2": bias(ks[9], HIDDEN),
        "w3": w(ks[10], (HIDDEN, HIDDEN)), "b3": bias(ks[11], HIDDEN),
        "wf": w(ks[12], (HIDDEN, ACTION_DIM)), "bf": bias(ks[13], ACTION_DIM),
    }


if __name__ == "__main__":
    key = jax.random.PRNGKey(0)
    k_p, k_s, k_x, k_n = jax.random.split(key, 4)

    params = make_params(k_p)
    sched = make_schedule(N_TIMESTEPS)
    emb_table = make_sinusoidal_table(N_TIMESTEPS, T_DIM)

    state = jax.random.normal(k_s, (B, STATE_DIM), dtype=jnp.float32)
    # torch.randn calls (initial x and per-step noise) are precomputed here so the
    # kernel is deterministic:
    x_init = jax.random.normal(k_x, (B, ACTION_DIM), dtype=jnp.float32)
    noise_steps = jax.random.normal(k_n, (N_TIMESTEPS, B, ACTION_DIM), dtype=jnp.float32)

    # one-time constant prep (hoisted out of the per-call path)
    const_slab = prepare_constants(params, emb_table)
    sampler = make_sampler(sched)

    action = jax.block_until_ready(sampler(const_slab, state, x_init, noise_steps))

    ref = jax.block_until_ready(
        reference_sample(state, x_init, noise_steps, emb_table, sched, params))

    assert action.shape == (B, ACTION_DIM)
    assert bool(jnp.all(jnp.isfinite(action)))
    assert bool(jnp.allclose(action, ref, atol=5e-2, rtol=5e-2))
    print("KERNEL_OK")
</pallas_src>

<mosaic_0001>
module attributes {stable_mosaic.version = 11 : i64} {
  func.func @kernel(%arg0: memref<160x128xf32, #tpu.memory_space<vmem>>, %arg1: memref<96x128xf32, #tpu.memory_space<vmem>>, %arg2: memref<2x8xf32, #tpu.memory_space<vmem>>) attributes {dimension_semantics = [], scalar_prefetch = 0 : i64, scratch_operands = 0 : i64, tpu.core_type = #tpu.core_type<tc>} {
    %c16 = arith.constant 16 : index
    %c0 = arith.constant 0 : index
    %0 = vector.load %arg0[%c16, %c0] : memref<160x128xf32, #tpu.memory_space<vmem>>, vector<8x32xf32>
    %1 = arith.truncf %0 : vector<8x32xf32> to vector<8x32xbf16>
    %c24 = arith.constant 24 : index
    %c0_0 = arith.constant 0 : index
    %2 = vector.load %arg0[%c24, %c0_0] : memref<160x128xf32, #tpu.memory_space<vmem>>, vector<16x32xf32>
    %3 = arith.truncf %2 : vector<16x32xf32> to vector<16x32xbf16>
    %c40 = arith.constant 40 : index
    %c0_1 = arith.constant 0 : index
    %4 = vector.load %arg0[%c40, %c0_1] : memref<160x128xf32, #tpu.memory_space<vmem>>, vector<32x32xf32>
    %5 = arith.truncf %4 : vector<32x32xf32> to vector<32x32xbf16>
    %c72 = arith.constant 72 : index
    %c0_2 = arith.constant 0 : index
    %6 = vector.load %arg0[%c72, %c0_2] : memref<160x128xf32, #tpu.memory_space<vmem>>, vector<1x32xf32>
    %c80 = arith.constant 80 : index
    %c0_3 = arith.constant 0 : index
    %7 = vector.load %arg0[%c80, %c0_3] : memref<160x128xf32, #tpu.memory_space<vmem>>, vector<32x32xf32>
    %8 = arith.truncf %7 : vector<32x32xf32> to vector<32x32xbf16>
    %c112 = arith.constant 112 : index
    %c0_4 = arith.constant 0 : index
    %9 = vector.load %arg0[%c112, %c0_4] : memref<160x128xf32, #tpu.memory_space<vmem>>, vector<1x32xf32>
    %c120 = arith.constant 120 : index
    %c0_5 = arith.constant 0 : index
    %10 = vector.load %arg0[%c120, %c0_5] : memref<160x128xf32, #tpu.memory_space<vmem>>, vector<32x8xf32>
    %11 = arith.truncf %10 : vector<32x8xf32> to vector<32x8xbf16>
    %c152 = arith.constant 152 : index
    %c0_6 = arith.constant 0 : index
    %12 = vector.load %arg0[%c152, %c0_6] : memref<160x128xf32, #tpu.memory_space<vmem>>, vector<1x8xf32>
    %c0_7 = arith.constant 0 : index
    %c0_8 = arith.constant 0 : index
    %13 = vector.load %arg1[%c0_7, %c0_8] : memref<96x128xf32, #tpu.memory_space<vmem>>, vector<2x8xf32>
    %c8 = arith.constant 8 : index
    %c0_9 = arith.constant 0 : index
    %14 = vector.load %arg1[%c8, %c0_9] : memref<96x128xf32, #tpu.memory_space<vmem>>, vector<2x16xf32>
    %15 = arith.truncf %14 : vector<2x16xf32> to vector<2x16xbf16>
    %cst = arith.constant dense<0.000000e+00> : vector<2x32xf32>
    %16 = tpu.matmul %15, %3, %cst {dimension_numbers = #tpu.dot_dimension_numbers<[1], [0], [0], [1], [0, 0, 1, 1], [], []>} : vector<2x16xbf16>, vector<16x32xbf16>, vector<2x32xf32> -> vector<2x32xf32>
    %c9 = arith.constant 9 : index
    %c0_10 = arith.constant 0 : index
    %17 = vector.load %arg0[%c9, %c0_10] : memref<160x128xf32, #tpu.memory_space<vmem>>, vector<1x32xf32>
    %18 = arith.truncf %13 : vector<2x8xf32> to vector<2x8xbf16>
    %cst_11 = arith.constant dense<0.000000e+00> : vector<2x32xf32>
    %19 = tpu.matmul %18, %1, %cst_11 {dimension_numbers = #tpu.dot_dimension_numbers<[1], [0], [0], [1], [0, 0, 1, 1], [], []>} : vector<2x8xbf16>, vector<8x32xbf16>, vector<2x32xf32> -> vector<2x32xf32>
    %20 = vector.broadcast %17 : vector<1x32xf32> to vector<2x32xf32>
    %21 = arith.addf %19, %20 : vector<2x32xf32>
    %22 = arith.addf %21, %16 : vector<2x32xf32>
    %cst_12 = arith.constant 2.000000e+01 : f32
    %23 = vector.broadcast %cst_12 : f32 to vector<2x32xf32>
    %24 = arith.minimumf %22, %23 : vector<2x32xf32>
    %25 = math.exp %24 : vector<2x32xf32>
    %cst_13 = arith.constant 1.000000e+00 : f32
    %26 = vector.broadcast %cst_13 : f32 to vector<2x32xf32>
    %27 = arith.addf %26, %25 : vector<2x32xf32>
    %cst_14 = arith.constant 2.000000e+00 : f32
    %28 = vector.broadcast %cst_14 : f32 to vector<2x32xf32>
    %29 = arith.mulf %28, %22 : vector<2x32xf32>
    %30 = arith.mulf %27, %27 : vector<2x32xf32>
    %cst_15 = arith.constant 1.000000e+00 : f32
    %31 = vector.broadcast %cst_15 : f32 to vector<2x32xf32>
    %32 = arith.addf %30, %31 : vector<2x32xf32>
    %33 = tpu.reciprocal %32 {approx = true} : vector<2x32xf32> -> vector<2x32xf32>
    %34 = arith.mulf %29, %33 : vector<2x32xf32>
    %35 = arith.subf %22, %34 : vector<2x32xf32>
    %36 = arith.truncf %35 : vector<2x32xf32> to vector<2x32xbf16>
    %cst_16 = arith.constant dense<0.000000e+00> : vector<2x32xf32>
    %37 = tpu.matmul %36, %5, %cst_16 {dimension_numbers = #tpu.dot_dimension_numbers<[1], [0], [0], [1], [0, 0, 1, 1], [], []>} : vector<2x32xbf16>, vector<32x32xbf16>, vector<2x32xf32> -> vector<2x32xf32>
    %38 = vector.broadcast %6 : vector<1x32xf32> to vector<2x32xf32>
    %39 = arith.addf %37, %38 : vector<2x32xf32>
    %cst_17 = arith.constant 2.000000e+01 : f32
    %40 = vector.broadcast %cst_17 : f32 to vector<2x32xf32>
    %41 = arith.minimumf %39, %40 : vector<2x32xf32>
    %42 = math.exp %41 : vector<2x32xf32>
    %cst_18 = arith.constant 1.000000e+00 : f32
    %43 = vector.broadcast %cst_18 : f32 to vector<2x32xf32>
    %44 = arith.addf %43, %42 : vector<2x32xf32>
    %cst_19 = arith.constant 2.000000e+00 : f32
    %45 = vector.broadcast %cst_19 : f32 to vector<2x32xf32>
    %46 = arith.mulf %45, %39 : vector<2x32xf32>
    %47 = arith.mulf %44, %44 : vector<2x32xf32>
    %cst_20 = arith.constant 1.000000e+00 : f32
    %48 = vector.broadcast %cst_20 : f32 to vector<2x32xf32>
    %49 = arith.addf %47, %48 : vector<2x32xf32>
    %50 = tpu.reciprocal %49 {approx = true} : vector<2x32xf32> -> vector<2x32xf32>
    %51 = arith.mulf %46, %50 : vector<2x32xf32>
    %52 = arith.subf %39, %51 : vector<2x32xf32>
    %53 = arith.truncf %52 : vector<2x32xf32> to vector<2x32xbf16>
    %cst_21 = arith.constant dense<0.000000e+00> : vector<2x32xf32>
    %54 = tpu.matmul %53, %8, %cst_21 {dimension_numbers = #tpu.dot_dimension_numbers<[1], [0], [0], [1], [0, 0, 1, 1], [], []>} : vector<2x32xbf16>, vector<32x32xbf16>, vector<2x32xf32> -> vector<2x32xf32>
    %55 = vector.broadcast %9 : vector<1x32xf32> to vector<2x32xf32>
    %56 = arith.addf %54, %55 : vector<2x32xf32>
    %cst_22 = arith.constant 2.000000e+01 : f32
    %57 = vector.broadcast %cst_22 : f32 to vector<2x32xf32>
    %58 = arith.minimumf %56, %57 : vector<2x32xf32>
    %59 = math.exp %58 : vector<2x32xf32>
    %cst_23 = arith.constant 1.000000e+00 : f32
    %60 = vector.broadcast %cst_23 : f32 to vector<2x32xf32>
    %61 = arith.addf %60, %59 : vector<2x32xf32>
    %cst_24 = arith.constant 2.000000e+00 : f32
    %62 = vector.broadcast %cst_24 : f32 to vector<2x32xf32>
    %63 = arith.mulf %62, %56 : vector<2x32xf32>
    %64 = arith.mulf %61, %61 : vector<2x32xf32>
    %cst_25 = arith.constant 1.000000e+00 : f32
    %65 = vector.broadcast %cst_25 : f32 to vector<2x32xf32>
    %66 = arith.addf %64, %65 : vector<2x32xf32>
    %67 = tpu.reciprocal %66 {approx = true} : vector<2x32xf32> -> vector<2x32xf32>
    %68 = arith.mulf %63, %67 : vector<2x32xf32>
    %69 = arith.subf %56, %68 : vector<2x32xf32>
    %70 = arith.truncf %69 : vector<2x32xf32> to vector<2x32xbf16>
    %cst_26 = arith.constant dense<0.000000e+00> : vector<2x8xf32>
    %71 = tpu.matmul %70, %11, %cst_26 {dimension_numbers = #tpu.dot_dimension_numbers<[1], [0], [0], [1], [0, 0, 1, 1], [], []>} : vector<2x32xbf16>, vector<32x8xbf16>, vector<2x8xf32> -> vector<2x8xf32>
    %72 = vector.broadcast %12 : vector<1x8xf32> to vector<2x8xf32>
    %73 = arith.addf %71, %72 : vector<2x8xf32>
    %cst_27 = arith.constant 1.05190957 : f32
    %74 = vector.broadcast %cst_27 : f32 to vector<2x8xf32>
    %75 = arith.mulf %74, %13 : vector<2x8xf32>
    %cst_28 = arith.constant 0.326364249 : f32
    %76 = vector.broadcast %cst_28 : f32 to vector<2x8xf32>
    %77 = arith.mulf %76, %73 : vector<2x8xf32>
    %78 = arith.subf %75, %77 : vector<2x8xf32>
    %cst_29 = arith.constant -1.000000e+00 : f32
    %cst_30 = arith.constant 1.000000e+00 : f32
    %79 = vector.broadcast %cst_29 : f32 to vector<2x8xf32>
    %80 = arith.maximumf %79, %78 : vector<2x8xf32>
    %81 = vector.broadcast %cst_30 : f32 to vector<2x8xf32>
    %82 = arith.minimumf %81, %80 : vector<2x8xf32>
    %cst_31 = arith.constant 0.19952175 : f32
    %83 = vector.broadcast %cst_31 : f32 to vector<2x8xf32>
    %84 = arith.mulf %83, %82 : vector<2x8xf32>
    %cst_32 = arith.constant 0.800273954 : f32
    %85 = vector.broadcast %cst_32 : f32 to vector<2x8xf32>
    %86 = arith.mulf %85, %13 : vector<2x8xf32>
    %87 = arith.addf %84, %86 : vector<2x8xf32>
    %c16_33 = arith.constant 16 : index
    %c0_34 = arith.constant 0 : index
    %88 = vector.load %arg1[%c16_33, %c0_34] : memref<96x128xf32, #tpu.memory_space<vmem>>, vector<2x8xf32>
    %89 = arith.addf %87, %88 : vector<2x8xf32>
    %c8_35 = arith.constant 8 : index
    %c0_36 = arith.constant 0 : index
    %90 = vector.load %arg0[%c8_35, %c0_36] : memref<160x128xf32, #tpu.memory_space<vmem>>, vector<1x32xf32>
    %91 = arith.truncf %89 : vector<2x8xf32> to vector<2x8xbf16>
    %cst_37 = arith.constant dense<0.000000e+00> : vector<2x32xf32>
    %92 = tpu.matmul %91, %1, %cst_37 {dimension_numbers = #tpu.dot_dimension_numbers<[1], [0], [0], [1], [0, 0, 1, 1], [], []>} : vector<2x8xbf16>, vector<8x32xbf16>, vector<2x32xf32> -> vector<2x32xf32>
    %93 = vector.broadcast %90 : vector<1x32xf32> to vector<2x32xf32>
    %94 = arith.addf %92, %93 : vector<2x32xf32>
    %95 = arith.addf %94, %16 : vector<2x32xf32>
    %cst_38 = arith.constant 2.000000e+01 : f32
    %96 = vector.broadcast %cst_38 : f32 to vector<2x32xf32>
    %97 = arith.minimumf %95, %96 : vector<2x32xf32>
    %98 = math.exp %97 : vector<2x32xf32>
    %cst_39 = arith.constant 1.000000e+00 : f32
    %99 = vector.broadcast %cst_39 : f32 to vector<2x32xf32>
    %100 = arith.addf %99, %98 : vector<2x32xf32>
    %cst_40 = arith.constant 2.000000e+00 : f32
    %101 = vector.broadcast %cst_40 : f32 to vector<2x32xf32>
    %102 = arith.mulf %101, %95 : vector<2x32xf32>
    %103 = arith.mulf %100, %100 : vector<2x32xf32>
    %cst_41 = arith.constant 1.000000e+00 : f32
    %104 = vector.broadcast %cst_41 : f32 to vector<2x32xf32>
    %105 = arith.addf %103, %104 : vector<2x32xf32>
    %106 = tpu.reciprocal %105 {approx = true} : vector<2x32xf32> -> vector<2x32xf32>
    %107 = arith.mulf %102, %106 : vector<2x32xf32>
    %108 = arith.subf %95, %107 : vector<2x32xf32>
    %109 = arith.truncf %108 : vector<2x32xf32> to vector<2x32xbf16>
    %cst_42 = arith.constant dense<0.000000e+00> : vector<2x32xf32>
    %110 = tpu.matmul %109, %5, %cst_42 {dimension_numbers = #tpu.dot_dimension_numbers<[1], [0], [0], [1], [0, 0, 1, 1], [], []>} : vector<2x32xbf16>, vector<32x32xbf16>, vector<2x32xf32> -> vector<2x32xf32>
    %111 = vector.broadcast %6 : vector<1x32xf32> to vector<2x32xf32>
    %112 = arith.addf %110, %111 : vector<2x32xf32>
    %cst_43 = arith.constant 2.000000e+01 : f32
    %113 = vector.broadcast %cst_43 : f32 to vector<2x32xf32>
    %114 = arith.minimumf %112, %113 : vector<2x32xf32>
    %115 = math.exp %114 : vector<2x32xf32>
    %cst_44 = arith.constant 1.000000e+00 : f32
    %116 = vector.broadcast %cst_44 : f32 to vector<2x32xf32>
    %117 = arith.addf %116, %115 : vector<2x32xf32>
    %cst_45 = arith.constant 2.000000e+00 : f32
    %118 = vector.broadcast %cst_45 : f32 to vector<2x32xf32>
    %119 = arith.mulf %118, %112 : vector<2x32xf32>
    %120 = arith.mulf %117, %117 : vector<2x32xf32>
    %cst_46 = arith.constant 1.000000e+00 : f32
    %121 = vector.broadcast %cst_46 : f32 to vector<2x32xf32>
    %122 = arith.addf %120, %121 : vector<2x32xf32>
    %123 = tpu.reciprocal %122 {approx = true} : vector<2x32xf32> -> vector<2x32xf32>
    %124 = arith.mulf %119, %123 : vector<2x32xf32>
    %125 = arith.subf %112, %124 : vector<2x32xf32>
    %126 = arith.truncf %125 : vector<2x32xf32> to vector<2x32xbf16>
    %cst_47 = arith.constant dense<0.000000e+00> : vector<2x32xf32>
    %127 = tpu.matmul %126, %8, %cst_47 {dimension_numbers = #tpu.dot_dimension_numbers<[1], [0], [0], [1], [0, 0, 1, 1], [], []>} : vector<2x32xbf16>, vector<32x32xbf16>, vector<2x32xf32> -> vector<2x32xf32>
    %128 = vector.broadcast %9 : vector<1x32xf32> to vector<2x32xf32>
    %129 = arith.addf %127, %128 : vector<2x32xf32>
    %cst_48 = arith.constant 2.000000e+01 : f32
    %130 = vector.broadcast %cst_48 : f32 to vector<2x32xf32>
    %131 = arith.minimumf %129, %130 : vector<2x32xf32>
    %132 = math.exp %131 : vector<2x32xf32>
    %cst_49 = arith.constant 1.000000e+00 : f32
    %133 = vector.broadcast %cst_49 : f32 to vector<2x32xf32>
    %134 = arith.addf %133, %132 : vector<2x32xf32>
    %cst_50 = arith.constant 2.000000e+00 : f32
    %135 = vector.broadcast %cst_50 : f32 to vector<2x32xf32>
    %136 = arith.mulf %135, %129 : vector<2x32xf32>
    %137 = arith.mulf %134, %134 : vector<2x32xf32>
    %cst_51 = arith.constant 1.000000e+00 : f32
    %138 = vector.broadcast %cst_51 : f32 to vector<2x32xf32>
    %139 = arith.addf %137, %138 : vector<2x32xf32>
    %140 = tpu.reciprocal %139 {approx = true} : vector<2x32xf32> -> vector<2x32xf32>
    %141 = arith.mulf %136, %140 : vector<2x32xf32>
    %142 = arith.subf %129, %141 : vector<2x32xf32>
    %143 = arith.truncf %142 : vector<2x32xf32> to vector<2x32xbf16>
    %cst_52 = arith.constant dense<0.000000e+00> : vector<2x8xf32>
    %144 = tpu.matmul %143, %11, %cst_52 {dimension_numbers = #tpu.dot_dimension_numbers<[1], [0], [0], [1], [0, 0, 1, 1], [], []>} : vector<2x32xbf16>, vector<32x8xbf16>, vector<2x8xf32> -> vector<2x8xf32>
    %145 = vector.broadcast %12 : vector<1x8xf32> to vector<2x8xf32>
    %146 = arith.addf %144, %145 : vector<2x8xf32>
    %cst_53 = arith.constant 1.04133725 : f32
    %147 = vector.broadcast %cst_53 : f32 to vector<2x8xf32>
    %148 = arith.mulf %147, %89 : vector<2x8xf32>
    %cst_54 = arith.constant 0.290488154 : f32
    %149 = vector.broadcast %cst_54 : f32 to vector<2x8xf32>
    %150 = arith.mulf %149, %146 : vector<2x8xf32>
    %151 = arith.subf %148, %150 : vector<2x8xf32>
    %cst_55 = arith.constant -1.000000e+00 : f32
    %cst_56 = arith.constant 1.000000e+00 : f32
    %152 = vector.broadcast %cst_55 : f32 to vector<2x8xf32>
    %153 = arith.maximumf %152, %151 : vector<2x8xf32>
    %154 = vector.broadcast %cst_56 : f32 to vector<2x8xf32>
    %155 = arith.minimumf %154, %153 : vector<2x8xf32>
    %cst_57 = arith.constant 0.22150372 : f32
    %156 = vector.broadcast %cst_57 : f32 to vector<2x8xf32>
    %157 = arith.mulf %156, %155 : vector<2x8xf32>
    %cst_58 = arith.constant 7.783550e-01 : f32
    %158 = vector.broadcast %cst_58 : f32 to vector<2x8xf32>
    %159 = arith.mulf %158, %89 : vector<2x8xf32>
    %160 = arith.addf %157, %159 : vector<2x8xf32>
    %c24_59 = arith.constant 24 : index
    %c0_60 = arith.constant 0 : index
    %161 = vector.load %arg1[%c24_59, %c0_60] : memref<96x128xf32, #tpu.memory_space<vmem>>, vector<2x8xf32>
    %162 = arith.addf %160, %161 : vector<2x8xf32>
    %c7 = arith.constant 7 : index
    %c0_61 = arith.constant 0 : index
    %163 = vector.load %arg0[%c7, %c0_61] : memref<160x128xf32, #tpu.memory_space<vmem>>, vector<1x32xf32>
    %164 = arith.truncf %162 : vector<2x8xf32> to vector<2x8xbf16>
    %cst_62 = arith.constant dense<0.000000e+00> : vector<2x32xf32>
    %165 = tpu.matmul %164, %1, %cst_62 {dimension_numbers = #tpu.dot_dimension_numbers<[1], [0], [0], [1], [0, 0, 1, 1], [], []>} : vector<2x8xbf16>, vector<8x32xbf16>, vector<2x32xf32> -> vector<2x32xf32>
    %166 = vector.broadcast %163 : vector<1x32xf32> to vector<2x32xf32>
    %167 = arith.addf %165, %166 : vector<2x32xf32>
    %168 = arith.addf %167, %16 : vector<2x32xf32>
    %cst_63 = arith.constant 2.000000e+01 : f32
    %169 = vector.broadcast %cst_63 : f32 to vector<2x32xf32>
    %170 = arith.minimumf %168, %169 : vector<2x32xf32>
    %171 = math.exp %170 : vector<2x32xf32>
    %cst_64 = arith.constant 1.000000e+00 : f32
    %172 = vector.broadcast %cst_64 : f32 to vector<2x32xf32>
    %173 = arith.addf %172, %171 : vector<2x32xf32>
    %cst_65 = arith.constant 2.000000e+00 : f32
    %174 = vector.broadcast %cst_65 : f32 to vector<2x32xf32>
    %175 = arith.mulf %174, %168 : vector<2x32xf32>
    %176 = arith.mulf %173, %173 : vector<2x32xf32>
    %cst_66 = arith.constant 1.000000e+00 : f32
    %177 = vector.broadcast %cst_66 : f32 to vector<2x32xf32>
    %178 = arith.addf %176, %177 : vector<2x32xf32>
    %179 = tpu.reciprocal %178 {approx = true} : vector<2x32xf32> -> vector<2x32xf32>
    %180 = arith.mulf %175, %179 : vector<2x32xf32>
    %181 = arith.subf %168, %180 : vector<2x32xf32>
    %182 = arith.truncf %181 : vector<2x32xf32> to vector<2x32xbf16>
    %cst_67 = arith.constant dense<0.000000e+00> : vector<2x32xf32>
    %183 = tpu.matmul %182, %5, %cst_67 {dimension_numbers = #tpu.dot_dimension_numbers<[1], [0], [0], [1], [0, 0, 1, 1], [], []>} : vector<2x32xbf16>, vector<32x32xbf16>, vector<2x32xf32> -> vector<2x32xf32>
    %184 = vector.broadcast %6 : vector<1x32xf32> to vector<2x32xf32>
    %185 = arith.addf %183, %184 : vector<2x32xf32>
    %cst_68 = arith.constant 2.000000e+01 : f32
    %186 = vector.broadcast %cst_68 : f32 to vector<2x32xf32>
    %187 = arith.minimumf %185, %186 : vector<2x32xf32>
    %188 = math.exp %187 : vector<2x32xf32>
    %cst_69 = arith.constant 1.000000e+00 : f32
    %189 = vector.broadcast %cst_69 : f32 to vector<2x32xf32>
    %190 = arith.addf %189, %188 : vector<2x32xf32>
    %cst_70 = arith.constant 2.000000e+00 : f32
    %191 = vector.broadcast %cst_70 : f32 to vector<2x32xf32>
    %192 = arith.mulf %191, %185 : vector<2x32xf32>
    %193 = arith.mulf %190, %190 : vector<2x32xf32>
    %cst_71 = arith.constant 1.000000e+00 : f32
    %194 = vector.broadcast %cst_71 : f32 to vector<2x32xf32>
    %195 = arith.addf %193, %194 : vector<2x32xf32>
    %196 = tpu.reciprocal %195 {approx = true} : vector<2x32xf32> -> vector<2x32xf32>
    %197 = arith.mulf %192, %196 : vector<2x32xf32>
    %198 = arith.subf %185, %197 : vector<2x32xf32>
    %199 = arith.truncf %198 : vector<2x32xf32> to vector<2x32xbf16>
    %cst_72 = arith.constant dense<0.000000e+00> : vector<2x32xf32>
    %200 = tpu.matmul %199, %8, %cst_72 {dimension_numbers = #tpu.dot_dimension_numbers<[1], [0], [0], [1], [0, 0, 1, 1], [], []>} : vector<2x32xbf16>, vector<32x32xbf16>, vector<2x32xf32> -> vector<2x32xf32>
    %201 = vector.broadcast %9 : vector<1x32xf32> to vector<2x32xf32>
    %202 = arith.addf %200, %201 : vector<2x32xf32>
    %cst_73 = arith.constant 2.000000e+01 : f32
    %203 = vector.broadcast %cst_73 : f32 to vector<2x32xf32>
    %204 = arith.minimumf %202, %203 : vector<2x32xf32>
    %205 = math.exp %204 : vector<2x32xf32>
    %cst_74 = arith.constant 1.000000e+00 : f32
    %206 = vector.broadcast %cst_74 : f32 to vector<2x32xf32>
    %207 = arith.addf %206, %205 : vector<2x32xf32>
    %cst_75 = arith.constant 2.000000e+00 : f32
    %208 = vector.broadcast %cst_75 : f32 to vector<2x32xf32>
    %209 = arith.mulf %208, %202 : vector<2x32xf32>
    %210 = arith.mulf %207, %207 : vector<2x32xf32>
    %cst_76 = arith.constant 1.000000e+00 : f32
    %211 = vector.broadcast %cst_76 : f32 to vector<2x32xf32>
    %212 = arith.addf %210, %211 : vector<2x32xf32>
    %213 = tpu.reciprocal %212 {approx = true} : vector<2x32xf32> -> vector<2x32xf32>
    %214 = arith.mulf %209, %213 : vector<2x32xf32>
    %215 = arith.subf %202, %214 : vector<2x32xf32>
    %216 = arith.truncf %215 : vector<2x32xf32> to vector<2x32xbf16>
    %cst_77 = arith.constant dense<0.000000e+00> : vector<2x8xf32>
    %217 = tpu.matmul %216, %11, %cst_77 {dimension_numbers = #tpu.dot_dimension_numbers<[1], [0], [0], [1], [0, 0, 1, 1], [], []>} : vector<2x32xbf16>, vector<32x8xbf16>, vector<2x8xf32> -> vector<2x8xf32>
    %218 = vector.broadcast %12 : vector<1x8xf32> to vector<2x8xf32>
    %219 = arith.addf %217, %218 : vector<2x8xf32>
    %cst_78 = arith.constant 1.03203368 : f32
    %220 = vector.broadcast %cst_78 : f32 to vector<2x8xf32>
    %221 = arith.mulf %220, %162 : vector<2x8xf32>
    %cst_79 = arith.constant 0.255134076 : f32
    %222 = vector.broadcast %cst_79 : f32 to vector<2x8xf32>
    %223 = arith.mulf %222, %219 : vector<2x8xf32>
    %224 = arith.subf %221, %223 : vector<2x8xf32>
    %cst_80 = arith.constant -1.000000e+00 : f32
    %cst_81 = arith.constant 1.000000e+00 : f32
    %225 = vector.broadcast %cst_80 : f32 to vector<2x8xf32>
    %226 = arith.maximumf %225, %224 : vector<2x8xf32>
    %227 = vector.broadcast %cst_81 : f32 to vector<2x8xf32>
    %228 = arith.minimumf %227, %226 : vector<2x8xf32>
    %cst_82 = arith.constant 0.248926818 : f32
    %229 = vector.broadcast %cst_82 : f32 to vector<2x8xf32>
    %230 = arith.mulf %229, %228 : vector<2x8xf32>
    %cst_83 = arith.constant 0.750980317 : f32
    %231 = vector.broadcast %cst_83 : f32 to vector<2x8xf32>
    %232 = arith.mulf %231, %162 : vector<2x8xf32>
    %233 = arith.addf %230, %232 : vector<2x8xf32>
    %c32 = arith.constant 32 : index
    %c0_84 = arith.constant 0 : index
    %234 = vector.load %arg1[%c32, %c0_84] : memref<96x128xf32, #tpu.memory_space<vmem>>, vector<2x8xf32>
    %235 = arith.addf %233, %234 : vector<2x8xf32>
    %c6 = arith.constant 6 : index
    %c0_85 = arith.constant 0 : index
    %236 = vector.load %arg0[%c6, %c0_85] : memref<160x128xf32, #tpu.memory_space<vmem>>, vector<1x32xf32>
    %237 = arith.truncf %235 : vector<2x8xf32> to vector<2x8xbf16>
    %cst_86 = arith.constant dense<0.000000e+00> : vector<2x32xf32>
    %238 = tpu.matmul %237, %1, %cst_86 {dimension_numbers = #tpu.dot_dimension_numbers<[1], [0], [0], [1], [0, 0, 1, 1], [], []>} : vector<2x8xbf16>, vector<8x32xbf16>, vector<2x32xf32> -> vector<2x32xf32>
    %239 = vector.broadcast %236 : vector<1x32xf32> to vector<2x32xf32>
    %240 = arith.addf %238, %239 : vector<2x32xf32>
    %241 = arith.addf %240, %16 : vector<2x32xf32>
    %cst_87 = arith.constant 2.000000e+01 : f32
    %242 = vector.broadcast %cst_87 : f32 to vector<2x32xf32>
    %243 = arith.minimumf %241, %242 : vector<2x32xf32>
    %244 = math.exp %243 : vector<2x32xf32>
    %cst_88 = arith.constant 1.000000e+00 : f32
    %245 = vector.broadcast %cst_88 : f32 to vector<2x32xf32>
    %246 = arith.addf %245, %244 : vector<2x32xf32>
    %cst_89 = arith.constant 2.000000e+00 : f32
    %247 = vector.broadcast %cst_89 : f32 to vector<2x32xf32>
    %248 = arith.mulf %247, %241 : vector<2x32xf32>
    %249 = arith.mulf %246, %246 : vector<2x32xf32>
    %cst_90 = arith.constant 1.000000e+00 : f32
    %250 = vector.broadcast %cst_90 : f32 to vector<2x32xf32>
    %251 = arith.addf %249, %250 : vector<2x32xf32>
    %252 = tpu.reciprocal %251 {approx = true} : vector<2x32xf32> -> vector<2x32xf32>
    %253 = arith.mulf %248, %252 : vector<2x32xf32>
    %254 = arith.subf %241, %253 : vector<2x32xf32>
    %255 = arith.truncf %254 : vector<2x32xf32> to vector<2x32xbf16>
    %cst_91 = arith.constant dense<0.000000e+00> : vector<2x32xf32>
    %256 = tpu.matmul %255, %5, %cst_91 {dimension_numbers = #tpu.dot_dimension_numbers<[1], [0], [0], [1], [0, 0, 1, 1], [], []>} : vector<2x32xbf16>, vector<32x32xbf16>, vector<2x32xf32> -> vector<2x32xf32>
    %257 = vector.broadcast %6 : vector<1x32xf32> to vector<2x32xf32>
    %258 = arith.addf %256, %257 : vector<2x32xf32>
    %cst_92 = arith.constant 2.000000e+01 : f32
    %259 = vector.broadcast %cst_92 : f32 to vector<2x32xf32>
    %260 = arith.minimumf %258, %259 : vector<2x32xf32>
    %261 = math.exp %260 : vector<2x32xf32>
    %cst_93 = arith.constant 1.000000e+00 : f32
    %262 = vector.broadcast %cst_93 : f32 to vector<2x32xf32>
    %263 = arith.addf %262, %261 : vector<2x32xf32>
    %cst_94 = arith.constant 2.000000e+00 : f32
    %264 = vector.broadcast %cst_94 : f32 to vector<2x32xf32>
    %265 = arith.mulf %264, %258 : vector<2x32xf32>
    %266 = arith.mulf %263, %263 : vector<2x32xf32>
    %cst_95 = arith.constant 1.000000e+00 : f32
    %267 = vector.broadcast %cst_95 : f32 to vector<2x32xf32>
    %268 = arith.addf %266, %267 : vector<2x32xf32>
    %269 = tpu.reciprocal %268 {approx = true} : vector<2x32xf32> -> vector<2x32xf32>
    %270 = arith.mulf %265, %269 : vector<2x32xf32>
    %271 = arith.subf %258, %270 : vector<2x32xf32>
    %272 = arith.truncf %271 : vector<2x32xf32> to vector<2x32xbf16>
    %cst_96 = arith.constant dense<0.000000e+00> : vector<2x32xf32>
    %273 = tpu.matmul %272, %8, %cst_96 {dimension_numbers = #tpu.dot_dimension_numbers<[1], [0], [0], [1], [0, 0, 1, 1], [], []>} : vector<2x32xbf16>, vector<32x32xbf16>, vector<2x32xf32> -> vector<2x32xf32>
    %274 = vector.broadcast %9 : vector<1x32xf32> to vector<2x32xf32>
    %275 = arith.addf %273, %274 : vector<2x32xf32>
    %cst_97 = arith.constant 2.000000e+01 : f32
    %276 = vector.broadcast %cst_97 : f32 to vector<2x32xf32>
    %277 = arith.minimumf %275, %276 : vector<2x32xf32>
    %278 = math.exp %277 : vector<2x32xf32>
    %cst_98 = arith.constant 1.000000e+00 : f32
    %279 = vector.broadcast %cst_98 : f32 to vector<2x32xf32>
    %280 = arith.addf %279, %278 : vector<2x32xf32>
    %cst_99 = arith.constant 2.000000e+00 : f32
    %281 = vector.broadcast %cst_99 : f32 to vector<2x32xf32>
    %282 = arith.mulf %281, %275 : vector<2x32xf32>
    %283 = arith.mulf %280, %280 : vector<2x32xf32>
    %cst_100 = arith.constant 1.000000e+00 : f32
    %284 = vector.broadcast %cst_100 : f32 to vector<2x32xf32>
    %285 = arith.addf %283, %284 : vector<2x32xf32>
    %286 = tpu.reciprocal %285 {approx = true} : vector<2x32xf32> -> vector<2x32xf32>
    %287 = arith.mulf %282, %286 : vector<2x32xf32>
    %288 = arith.subf %275, %287 : vector<2x32xf32>
    %289 = arith.truncf %288 : vector<2x32xf32> to vector<2x32xbf16>
    %cst_101 = arith.constant dense<0.000000e+00> : vector<2x8xf32>
    %290 = tpu.matmul %289, %11, %cst_101 {dimension_numbers = #tpu.dot_dimension_numbers<[1], [0], [0], [1], [0, 0, 1, 1], [], []>} : vector<2x32xbf16>, vector<32x8xbf16>, vector<2x8xf32> -> vector<2x8xf32>
    %291 = vector.broadcast %12 : vector<1x8xf32> to vector<2x8xf32>
    %292 = arith.addf %290, %291 : vector<2x8xf32>
    %cst_102 = arith.constant 1.02396369 : f32
    %293 = vector.broadcast %cst_102 : f32 to vector<2x8xf32>
    %294 = arith.mulf %293, %235 : vector<2x8xf32>
    %cst_103 = arith.constant 0.220230818 : f32
    %295 = vector.broadcast %cst_103 : f32 to vector<2x8xf32>
    %296 = arith.mulf %295, %292 : vector<2x8xf32>
    %297 = arith.subf %294, %296 : vector<2x8xf32>
    %cst_104 = arith.constant -1.000000e+00 : f32
    %cst_105 = arith.constant 1.000000e+00 : f32
    %298 = vector.broadcast %cst_104 : f32 to vector<2x8xf32>
    %299 = arith.maximumf %298, %297 : vector<2x8xf32>
    %300 = vector.broadcast %cst_105 : f32 to vector<2x8xf32>
    %301 = arith.minimumf %300, %299 : vector<2x8xf32>
    %cst_106 = arith.constant 0.284101486 : f32
    %302 = vector.broadcast %cst_106 : f32 to vector<2x8xf32>
    %303 = arith.mulf %302, %301 : vector<2x8xf32>
    %cst_107 = arith.constant 0.715842068 : f32
    %304 = vector.broadcast %cst_107 : f32 to vector<2x8xf32>
    %305 = arith.mulf %304, %235 : vector<2x8xf32>
    %306 = arith.addf %303, %305 : vector<2x8xf32>
    %c40_108 = arith.constant 40 : index
    %c0_109 = arith.constant 0 : index
    %307 = vector.load %arg1[%c40_108, %c0_109] : memref<96x128xf32, #tpu.memory_space<vmem>>, vector<2x8xf32>
    %308 = arith.addf %306, %307 : vector<2x8xf32>
    %c5 = arith.constant 5 : index
    %c0_110 = arith.constant 0 : index
    %309 = vector.load %arg0[%c5, %c0_110] : memref<160x128xf32, #tpu.memory_space<vmem>>, vector<1x32xf32>
    %310 = arith.truncf %308 : vector<2x8xf32> to vector<2x8xbf16>
    %cst_111 = arith.constant dense<0.000000e+00> : vector<2x32xf32>
    %311 = tpu.matmul %310, %1, %cst_111 {dimension_numbers = #tpu.dot_dimension_numbers<[1], [0], [0], [1], [0, 0, 1, 1], [], []>} : vector<2x8xbf16>, vector<8x32xbf16>, vector<2x32xf32> -> vector<2x32xf32>
    %312 = vector.broadcast %309 : vector<1x32xf32> to vector<2x32xf32>
    %313 = arith.addf %311, %312 : vector<2x32xf32>
    %314 = arith.addf %313, %16 : vector<2x32xf32>
    %cst_112 = arith.constant 2.000000e+01 : f32
    %315 = vector.broadcast %cst_112 : f32 to vector<2x32xf32>
    %316 = arith.minimumf %314, %315 : vector<2x32xf32>
    %317 = math.exp %316 : vector<2x32xf32>
    %cst_113 = arith.constant 1.000000e+00 : f32
    %318 = vector.broadcast %cst_113 : f32 to vector<2x32xf32>
    %319 = arith.addf %318, %317 : vector<2x32xf32>
    %cst_114 = arith.constant 2.000000e+00 : f32
    %320 = vector.broadcast %cst_114 : f32 to vector<2x32xf32>
    %321 = arith.mulf %320, %314 : vector<2x32xf32>
    %322 = arith.mulf %319, %319 : vector<2x32xf32>
    %cst_115 = arith.constant 1.000000e+00 : f32
    %323 = vector.broadcast %cst_115 : f32 to vector<2x32xf32>
    %324 = arith.addf %322, %323 : vector<2x32xf32>
    %325 = tpu.reciprocal %324 {approx = true} : vector<2x32xf32> -> vector<2x32xf32>
    %326 = arith.mulf %321, %325 : vector<2x32xf32>
    %327 = arith.subf %314, %326 : vector<2x32xf32>
    %328 = arith.truncf %327 : vector<2x32xf32> to vector<2x32xbf16>
    %cst_116 = arith.constant dense<0.000000e+00> : vector<2x32xf32>
    %329 = tpu.matmul %328, %5, %cst_116 {dimension_numbers = #tpu.dot_dimension_numbers<[1], [0], [0], [1], [0, 0, 1, 1], [], []>} : vector<2x32xbf16>, vector<32x32xbf16>, vector<2x32xf32> -> vector<2x32xf32>
    %330 = vector.broadcast %6 : vector<1x32xf32> to vector<2x32xf32>
    %331 = arith.addf %329, %330 : vector<2x32xf32>
    %cst_117 = arith.constant 2.000000e+01 : f32
    %332 = vector.broadcast %cst_117 : f32 to vector<2x32xf32>
    %333 = arith.minimumf %331, %332 : vector<2x32xf32>
    %334 = math.exp %333 : vector<2x32xf32>
    %cst_118 = arith.constant 1.000000e+00 : f32
    %335 = vector.broadcast %cst_118 : f32 to vector<2x32xf32>
    %336 = arith.addf %335, %334 : vector<2x32xf32>
    %cst_119 = arith.constant 2.000000e+00 : f32
    %337 = vector.broadcast %cst_119 : f32 to vector<2x32xf32>
    %338 = arith.mulf %337, %331 : vector<2x32xf32>
    %339 = arith.mulf %336, %336 : vector<2x32xf32>
    %cst_120 = arith.constant 1.000000e+00 : f32
    %340 = vector.broadcast %cst_120 : f32 to vector<2x32xf32>
    %341 = arith.addf %339, %340 : vector<2x32xf32>
    %342 = tpu.reciprocal %341 {approx = true} : vector<2x32xf32> -> vector<2x32xf32>
    %343 = arith.mulf %338, %342 : vector<2x32xf32>
    %344 = arith.subf %331, %343 : vector<2x32xf32>
    %345 = arith.truncf %344 : vector<2x32xf32> to vector<2x32xbf16>
    %cst_121 = arith.constant dense<0.000000e+00> : vector<2x32xf32>
    %346 = tpu.matmul %345, %8, %cst_121 {dimension_numbers = #tpu.dot_dimension_numbers<[1], [0], [0], [1], [0, 0, 1, 1], [], []>} : vector<2x32xbf16>, vector<32x32xbf16>, vector<2x32xf32> -> vector<2x32xf32>
    %347 = vector.broadcast %9 : vector<1x32xf32> to vector<2x32xf32>
    %348 = arith.addf %346, %347 : vector<2x32xf32>
    %cst_122 = arith.constant 2.000000e+01 : f32
    %349 = vector.broadcast %cst_122 : f32 to vector<2x32xf32>
    %350 = arith.minimumf %348, %349 : vector<2x32xf32>
    %351 = math.exp %350 : vector<2x32xf32>
    %cst_123 = arith.constant 1.000000e+00 : f32
    %352 = vector.broadcast %cst_123 : f32 to vector<2x32xf32>
    %353 = arith.addf %352, %351 : vector<2x32xf32>
    %cst_124 = arith.constant 2.000000e+00 : f32
    %354 = vector.broadcast %cst_124 : f32 to vector<2x32xf32>
    %355 = arith.mulf %354, %348 : vector<2x32xf32>
    %356 = arith.mulf %353, %353 : vector<2x32xf32>
    %cst_125 = arith.constant 1.000000e+00 : f32
    %357 = vector.broadcast %cst_125 : f32 to vector<2x32xf32>
    %358 = arith.addf %356, %357 : vector<2x32xf32>
    %359 = tpu.reciprocal %358 {approx = true} : vector<2x32xf32> -> vector<2x32xf32>
    %360 = arith.mulf %355, %359 : vector<2x32xf32>
    %361 = arith.subf %348, %360 : vector<2x32xf32>
    %362 = arith.truncf %361 : vector<2x32xf32> to vector<2x32xbf16>
    %cst_126 = arith.constant dense<0.000000e+00> : vector<2x8xf32>
    %363 = tpu.matmul %362, %11, %cst_126 {dimension_numbers = #tpu.dot_dimension_numbers<[1], [0], [0], [1], [0, 0, 1, 1], [], []>} : vector<2x32xbf16>, vector<32x8xbf16>, vector<2x8xf32> -> vector<2x8xf32>
    %364 = vector.broadcast %12 : vector<1x8xf32> to vector<2x8xf32>
    %365 = arith.addf %363, %364 : vector<2x8xf32>
    %cst_127 = arith.constant 1.01709712 : f32
    %366 = vector.broadcast %cst_127 : f32 to vector<2x8xf32>
    %367 = arith.mulf %366, %308 : vector<2x8xf32>
    %cst_128 = arith.constant 0.185705826 : f32
    %368 = vector.broadcast %cst_128 : f32 to vector<2x8xf32>
    %369 = arith.mulf %368, %365 : vector<2x8xf32>
    %370 = arith.subf %367, %369 : vector<2x8xf32>
    %cst_129 = arith.constant -1.000000e+00 : f32
    %cst_130 = arith.constant 1.000000e+00 : f32
    %371 = vector.broadcast %cst_129 : f32 to vector<2x8xf32>
    %372 = arith.maximumf %371, %370 : vector<2x8xf32>
    %373 = vector.broadcast %cst_130 : f32 to vector<2x8xf32>
    %374 = arith.minimumf %373, %372 : vector<2x8xf32>
    %cst_131 = arith.constant 0.330855429 : f32
    %375 = vector.broadcast %cst_131 : f32 to vector<2x8xf32>
    %376 = arith.mulf %375, %374 : vector<2x8xf32>
    %cst_132 = arith.constant 0.669112503 : f32
    %377 = vector.broadcast %cst_132 : f32 to vector<2x8xf32>
    %378 = arith.mulf %377, %308 : vector<2x8xf32>
    %379 = arith.addf %376, %378 : vector<2x8xf32>
    %c48 = arith.constant 48 : index
    %c0_133 = arith.constant 0 : index
    %380 = vector.load %arg1[%c48, %c0_133] : memref<96x128xf32, #tpu.memory_space<vmem>>, vector<2x8xf32>
    %381 = arith.addf %379, %380 : vector<2x8xf32>
    %c4 = arith.constant 4 : index
    %c0_134 = arith.constant 0 : index
    %382 = vector.load %arg0[%c4, %c0_134] : memref<160x128xf32, #tpu.memory_space<vmem>>, vector<1x32xf32>
    %383 = arith.truncf %381 : vector<2x8xf32> to vector<2x8xbf16>
    %cst_135 = arith.constant dense<0.000000e+00> : vector<2x32xf32>
    %384 = tpu.matmul %383, %1, %cst_135 {dimension_numbers = #tpu.dot_dimension_numbers<[1], [0], [0], [1], [0, 0, 1, 1], [], []>} : vector<2x8xbf16>, vector<8x32xbf16>, vector<2x32xf32> -> vector<2x32xf32>
    %385 = vector.broadcast %382 : vector<1x32xf32> to vector<2x32xf32>
    %386 = arith.addf %384, %385 : vector<2x32xf32>
    %387 = arith.addf %386, %16 : vector<2x32xf32>
    %cst_136 = arith.constant 2.000000e+01 : f32
    %388 = vector.broadcast %cst_136 : f32 to vector<2x32xf32>
    %389 = arith.minimumf %387, %388 : vector<2x32xf32>
    %390 = math.exp %389 : vector<2x32xf32>
    %cst_137 = arith.constant 1.000000e+00 : f32
    %391 = vector.broadcast %cst_137 : f32 to vector<2x32xf32>
    %392 = arith.addf %391, %390 : vector<2x32xf32>
    %cst_138 = arith.constant 2.000000e+00 : f32
    %393 = vector.broadcast %cst_138 : f32 to vector<2x32xf32>
    %394 = arith.mulf %393, %387 : vector<2x32xf32>
    %395 = arith.mulf %392, %392 : vector<2x32xf32>
    %cst_139 = arith.constant 1.000000e+00 : f32
    %396 = vector.broadcast %cst_139 : f32 to vector<2x32xf32>
    %397 = arith.addf %395, %396 : vector<2x32xf32>
    %398 = tpu.reciprocal %397 {approx = true} : vector<2x32xf32> -> vector<2x32xf32>
    %399 = arith.mulf %394, %398 : vector<2x32xf32>
    %400 = arith.subf %387, %399 : vector<2x32xf32>
    %401 = arith.truncf %400 : vector<2x32xf32> to vector<2x32xbf16>
    %cst_140 = arith.constant dense<0.000000e+00> : vector<2x32xf32>
    %402 = tpu.matmul %401, %5, %cst_140 {dimension_numbers = #tpu.dot_dimension_numbers<[1], [0], [0], [1], [0, 0, 1, 1], [], []>} : vector<2x32xbf16>, vector<32x32xbf16>, vector<2x32xf32> -> vector<2x32xf32>
    %403 = vector.broadcast %6 : vector<1x32xf32> to vector<2x32xf32>
    %404 = arith.addf %402, %403 : vector<2x32xf32>
    %cst_141 = arith.constant 2.000000e+01 : f32
    %405 = vector.broadcast %cst_141 : f32 to vector<2x32xf32>
    %406 = arith.minimumf %404, %405 : vector<2x32xf32>
    %407 = math.exp %406 : vector<2x32xf32>
    %cst_142 = arith.constant 1.000000e+00 : f32
    %408 = vector.broadcast %cst_142 : f32 to vector<2x32xf32>
    %409 = arith.addf %408, %407 : vector<2x32xf32>
    %cst_143 = arith.constant 2.000000e+00 : f32
    %410 = vector.broadcast %cst_143 : f32 to vector<2x32xf32>
    %411 = arith.mulf %410, %404 : vector<2x32xf32>
    %412 = arith.mulf %409, %409 : vector<2x32xf32>
    %cst_144 = arith.constant 1.000000e+00 : f32
    %413 = vector.broadcast %cst_144 : f32 to vector<2x32xf32>
    %414 = arith.addf %412, %413 : vector<2x32xf32>
    %415 = tpu.reciprocal %414 {approx = true} : vector<2x32xf32> -> vector<2x32xf32>
    %416 = arith.mulf %411, %415 : vector<2x32xf32>
    %417 = arith.subf %404, %416 : vector<2x32xf32>
    %418 = arith.truncf %417 : vector<2x32xf32> to vector<2x32xbf16>
    %cst_145 = arith.constant dense<0.000000e+00> : vector<2x32xf32>
    %419 = tpu.matmul %418, %8, %cst_145 {dimension_numbers = #tpu.dot_dimension_numbers<[1], [0], [0], [1], [0, 0, 1, 1], [], []>} : vector<2x32xbf16>, vector<32x32xbf16>, vector<2x32xf32> -> vector<2x32xf32>
    %420 = vector.broadcast %9 : vector<1x32xf32> to vector<2x32xf32>
    %421 = arith.addf %419, %420 : vector<2x32xf32>
    %cst_146 = arith.constant 2.000000e+01 : f32
    %422 = vector.broadcast %cst_146 : f32 to vector<2x32xf32>
    %423 = arith.minimumf %421, %422 : vector<2x32xf32>
    %424 = math.exp %423 : vector<2x32xf32>
    %cst_147 = arith.constant 1.000000e+00 : f32
    %425 = vector.broadcast %cst_147 : f32 to vector<2x32xf32>
    %426 = arith.addf %425, %424 : vector<2x32xf32>
    %cst_148 = arith.constant 2.000000e+00 : f32
    %427 = vector.broadcast %cst_148 : f32 to vector<2x32xf32>
    %428 = arith.mulf %427, %421 : vector<2x32xf32>
    %429 = arith.mulf %426, %426 : vector<2x32xf32>
    %cst_149 = arith.constant 1.000000e+00 : f32
    %430 = vector.broadcast %cst_149 : f32 to vector<2x32xf32>
    %431 = arith.addf %429, %430 : vector<2x32xf32>
    %432 = tpu.reciprocal %431 {approx = true} : vector<2x32xf32> -> vector<2x32xf32>
    %433 = arith.mulf %428, %432 : vector<2x32xf32>
    %434 = arith.subf %421, %433 : vector<2x32xf32>
    %435 = arith.truncf %434 : vector<2x32xf32> to vector<2x32xbf16>
    %cst_150 = arith.constant dense<0.000000e+00> : vector<2x8xf32>
    %436 = tpu.matmul %435, %11, %cst_150 {dimension_numbers = #tpu.dot_dimension_numbers<[1], [0], [0], [1], [0, 0, 1, 1], [], []>} : vector<2x32xbf16>, vector<32x8xbf16>, vector<2x8xf32> -> vector<2x8xf32>
    %437 = vector.broadcast %12 : vector<1x8xf32> to vector<2x8xf32>
    %438 = arith.addf %436, %437 : vector<2x8xf32>
    %cst_151 = arith.constant 1.01140809 : f32
    %439 = vector.broadcast %cst_151 : f32 to vector<2x8xf32>
    %440 = arith.mulf %439, %381 : vector<2x8xf32>
    %cst_152 = arith.constant 0.151480556 : f32
    %441 = vector.broadcast %cst_152 : f32 to vector<2x8xf32>
    %442 = arith.mulf %441, %438 : vector<2x8xf32>
    %443 = arith.subf %440, %442 : vector<2x8xf32>
    %cst_153 = arith.constant -1.000000e+00 : f32
    %cst_154 = arith.constant 1.000000e+00 : f32
    %444 = vector.broadcast %cst_153 : f32 to vector<2x8xf32>
    %445 = arith.maximumf %444, %443 : vector<2x8xf32>
    %446 = vector.broadcast %cst_154 : f32 to vector<2x8xf32>
    %447 = arith.minimumf %446, %445 : vector<2x8xf32>
    %cst_155 = arith.constant 0.39601925 : f32
    %448 = vector.broadcast %cst_155 : f32 to vector<2x8xf32>
    %449 = arith.mulf %448, %447 : vector<2x8xf32>
    %cst_156 = arith.constant 0.603964508 : f32
    %450 = vector.broadcast %cst_156 : f32 to vector<2x8xf32>
    %451 = arith.mulf %450, %381 : vector<2x8xf32>
    %452 = arith.addf %449, %451 : vector<2x8xf32>
    %c56 = arith.constant 56 : index
    %c0_157 = arith.constant 0 : index
    %453 = vector.load %arg1[%c56, %c0_157] : memref<96x128xf32, #tpu.memory_space<vmem>>, vector<2x8xf32>
    %454 = arith.addf %452, %453 : vector<2x8xf32>
    %c3 = arith.constant 3 : index
    %c0_158 = arith.constant 0 : index
    %455 = vector.load %arg0[%c3, %c0_158] : memref<160x128xf32, #tpu.memory_space<vmem>>, vector<1x32xf32>
    %456 = arith.truncf %454 : vector<2x8xf32> to vector<2x8xbf16>
    %cst_159 = arith.constant dense<0.000000e+00> : vector<2x32xf32>
    %457 = tpu.matmul %456, %1, %cst_159 {dimension_numbers = #tpu.dot_dimension_numbers<[1], [0], [0], [1], [0, 0, 1, 1], [], []>} : vector<2x8xbf16>, vector<8x32xbf16>, vector<2x32xf32> -> vector<2x32xf32>
    %458 = vector.broadcast %455 : vector<1x32xf32> to vector<2x32xf32>
    %459 = arith.addf %457, %458 : vector<2x32xf32>
    %460 = arith.addf %459, %16 : vector<2x32xf32>
    %cst_160 = arith.constant 2.000000e+01 : f32
    %461 = vector.broadcast %cst_160 : f32 to vector<2x32xf32>
    %462 = arith.minimumf %460, %461 : vector<2x32xf32>
    %463 = math.exp %462 : vector<2x32xf32>
    %cst_161 = arith.constant 1.000000e+00 : f32
    %464 = vector.broadcast %cst_161 : f32 to vector<2x32xf32>
    %465 = arith.addf %464, %463 : vector<2x32xf32>
    %cst_162 = arith.constant 2.000000e+00 : f32
    %466 = vector.broadcast %cst_162 : f32 to vector<2x32xf32>
    %467 = arith.mulf %466, %460 : vector<2x32xf32>
    %468 = arith.mulf %465, %465 : vector<2x32xf32>
    %cst_163 = arith.constant 1.000000e+00 : f32
    %469 = vector.broadcast %cst_163 : f32 to vector<2x32xf32>
    %470 = arith.addf %468, %469 : vector<2x32xf32>
    %471 = tpu.reciprocal %470 {approx = true} : vector<2x32xf32> -> vector<2x32xf32>
    %472 = arith.mulf %467, %471 : vector<2x32xf32>
    %473 = arith.subf %460, %472 : vector<2x32xf32>
    %474 = arith.truncf %473 : vector<2x32xf32> to vector<2x32xbf16>
    %cst_164 = arith.constant dense<0.000000e+00> : vector<2x32xf32>
    %475 = tpu.matmul %474, %5, %cst_164 {dimension_numbers = #tpu.dot_dimension_numbers<[1], [0], [0], [1], [0, 0, 1, 1], [], []>} : vector<2x32xbf16>, vector<32x32xbf16>, vector<2x32xf32> -> vector<2x32xf32>
    %476 = vector.broadcast %6 : vector<1x32xf32> to vector<2x32xf32>
    %477 = arith.addf %475, %476 : vector<2x32xf32>
    %cst_165 = arith.constant 2.000000e+01 : f32
    %478 = vector.broadcast %cst_165 : f32 to vector<2x32xf32>
    %479 = arith.minimumf %477, %478 : vector<2x32xf32>
    %480 = math.exp %479 : vector<2x32xf32>
    %cst_166 = arith.constant 1.000000e+00 : f32
    %481 = vector.broadcast %cst_166 : f32 to vector<2x32xf32>
    %482 = arith.addf %481, %480 : vector<2x32xf32>
    %cst_167 = arith.constant 2.000000e+00 : f32
    %483 = vector.broadcast %cst_167 : f32 to vector<2x32xf32>
    %484 = arith.mulf %483, %477 : vector<2x32xf32>
    %485 = arith.mulf %482, %482 : vector<2x32xf32>
    %cst_168 = arith.constant 1.000000e+00 : f32
    %486 = vector.broadcast %cst_168 : f32 to vector<2x32xf32>
    %487 = arith.addf %485, %486 : vector<2x32xf32>
    %488 = tpu.reciprocal %487 {approx = true} : vector<2x32xf32> -> vector<2x32xf32>
    %489 = arith.mulf %484, %488 : vector<2x32xf32>
    %490 = arith.subf %477, %489 : vector<2x32xf32>
    %491 = arith.truncf %490 : vector<2x32xf32> to vector<2x32xbf16>
    %cst_169 = arith.constant dense<0.000000e+00> : vector<2x32xf32>
    %492 = tpu.matmul %491, %8, %cst_169 {dimension_numbers = #tpu.dot_dimension_numbers<[1], [0], [0], [1], [0, 0, 1, 1], [], []>} : vector<2x32xbf16>, vector<32x32xbf16>, vector<2x32xf32> -> vector<2x32xf32>
    %493 = vector.broadcast %9 : vector<1x32xf32> to vector<2x32xf32>
    %494 = arith.addf %492, %493 : vector<2x32xf32>
    %cst_170 = arith.constant 2.000000e+01 : f32
    %495 = vector.broadcast %cst_170 : f32 to vector<2x32xf32>
    %496 = arith.minimumf %494, %495 : vector<2x32xf32>
    %497 = math.exp %496 : vector<2x32xf32>
    %cst_171 = arith.constant 1.000000e+00 : f32
    %498 = vector.broadcast %cst_171 : f32 to vector<2x32xf32>
    %499 = arith.addf %498, %497 : vector<2x32xf32>
    %cst_172 = arith.constant 2.000000e+00 : f32
    %500 = vector.broadcast %cst_172 : f32 to vector<2x32xf32>
    %501 = arith.mulf %500, %494 : vector<2x32xf32>
    %502 = arith.mulf %499, %499 : vector<2x32xf32>
    %cst_173 = arith.constant 1.000000e+00 : f32
    %503 = vector.broadcast %cst_173 : f32 to vector<2x32xf32>
    %504 = arith.addf %502, %503 : vector<2x32xf32>
    %505 = tpu.reciprocal %504 {approx = true} : vector<2x32xf32> -> vector<2x32xf32>
    %506 = arith.mulf %501, %505 : vector<2x32xf32>
    %507 = arith.subf %494, %506 : vector<2x32xf32>
    %508 = arith.truncf %507 : vector<2x32xf32> to vector<2x32xbf16>
    %cst_174 = arith.constant dense<0.000000e+00> : vector<2x8xf32>
    %509 = tpu.matmul %508, %11, %cst_174 {dimension_numbers = #tpu.dot_dimension_numbers<[1], [0], [0], [1], [0, 0, 1, 1], [], []>} : vector<2x32xbf16>, vector<32x8xbf16>, vector<2x8xf32> -> vector<2x8xf32>
    %510 = vector.broadcast %12 : vector<1x8xf32> to vector<2x8xf32>
    %511 = arith.addf %509, %510 : vector<2x8xf32>
    %cst_175 = arith.constant 1.00687468 : f32
    %512 = vector.broadcast %cst_175 : f32 to vector<2x8xf32>
    %513 = arith.mulf %512, %454 : vector<2x8xf32>
    %cst_176 = arith.constant 0.117459297 : f32
    %514 = vector.broadcast %cst_176 : f32 to vector<2x8xf32>
    %515 = arith.mulf %514, %511 : vector<2x8xf32>
    %516 = arith.subf %513, %515 : vector<2x8xf32>
    %cst_177 = arith.constant -1.000000e+00 : f32
    %cst_178 = arith.constant 1.000000e+00 : f32
    %517 = vector.broadcast %cst_177 : f32 to vector<2x8xf32>
    %518 = arith.maximumf %517, %516 : vector<2x8xf32>
    %519 = vector.broadcast %cst_178 : f32 to vector<2x8xf32>
    %520 = arith.minimumf %519, %518 : vector<2x8xf32>
    %cst_179 = arith.constant 0.493057638 : f32
    %521 = vector.broadcast %cst_179 : f32 to vector<2x8xf32>
    %522 = arith.mulf %521, %520 : vector<2x8xf32>
    %cst_180 = arith.constant 0.506934762 : f32
    %523 = vector.broadcast %cst_180 : f32 to vector<2x8xf32>
    %524 = arith.mulf %523, %454 : vector<2x8xf32>
    %525 = arith.addf %522, %524 : vector<2x8xf32>
    %c64 = arith.constant 64 : index
    %c0_181 = arith.constant 0 : index
    %526 = vector.load %arg1[%c64, %c0_181] : memref<96x128xf32, #tpu.memory_space<vmem>>, vector<2x8xf32>
    %527 = arith.addf %525, %526 : vector<2x8xf32>
    %c2 = arith.constant 2 : index
    %c0_182 = arith.constant 0 : index
    %528 = vector.load %arg0[%c2, %c0_182] : memref<160x128xf32, #tpu.memory_space<vmem>>, vector<1x32xf32>
    %529 = arith.truncf %527 : vector<2x8xf32> to vector<2x8xbf16>
    %cst_183 = arith.constant dense<0.000000e+00> : vector<2x32xf32>
    %530 = tpu.matmul %529, %1, %cst_183 {dimension_numbers = #tpu.dot_dimension_numbers<[1], [0], [0], [1], [0, 0, 1, 1], [], []>} : vector<2x8xbf16>, vector<8x32xbf16>, vector<2x32xf32> -> vector<2x32xf32>
    %531 = vector.broadcast %528 : vector<1x32xf32> to vector<2x32xf32>
    %532 = arith.addf %530, %531 : vector<2x32xf32>
    %533 = arith.addf %532, %16 : vector<2x32xf32>
    %cst_184 = arith.constant 2.000000e+01 : f32
    %534 = vector.broadcast %cst_184 : f32 to vector<2x32xf32>
    %535 = arith.minimumf %533, %534 : vector<2x32xf32>
    %536 = math.exp %535 : vector<2x32xf32>
    %cst_185 = arith.constant 1.000000e+00 : f32
    %537 = vector.broadcast %cst_185 : f32 to vector<2x32xf32>
    %538 = arith.addf %537, %536 : vector<2x32xf32>
    %cst_186 = arith.constant 2.000000e+00 : f32
    %539 = vector.broadcast %cst_186 : f32 to vector<2x32xf32>
    %540 = arith.mulf %539, %533 : vector<2x32xf32>
    %541 = arith.mulf %538, %538 : vector<2x32xf32>
    %cst_187 = arith.constant 1.000000e+00 : f32
    %542 = vector.broadcast %cst_187 : f32 to vector<2x32xf32>
    %543 = arith.addf %541, %542 : vector<2x32xf32>
    %544 = tpu.reciprocal %543 {approx = true} : vector<2x32xf32> -> vector<2x32xf32>
    %545 = arith.mulf %540, %544 : vector<2x32xf32>
    %546 = arith.subf %533, %545 : vector<2x32xf32>
    %547 = arith.truncf %546 : vector<2x32xf32> to vector<2x32xbf16>
    %cst_188 = arith.constant dense<0.000000e+00> : vector<2x32xf32>
    %548 = tpu.matmul %547, %5, %cst_188 {dimension_numbers = #tpu.dot_dimension_numbers<[1], [0], [0], [1], [0, 0, 1, 1], [], []>} : vector<2x32xbf16>, vector<32x32xbf16>, vector<2x32xf32> -> vector<2x32xf32>
    %549 = vector.broadcast %6 : vector<1x32xf32> to vector<2x32xf32>
    %550 = arith.addf %548, %549 : vector<2x32xf32>
    %cst_189 = arith.constant 2.000000e+01 : f32
    %551 = vector.broadcast %cst_189 : f32 to vector<2x32xf32>
    %552 = arith.minimumf %550, %551 : vector<2x32xf32>
    %553 = math.exp %552 : vector<2x32xf32>
    %cst_190 = arith.constant 1.000000e+00 : f32
    %554 = vector.broadcast %cst_190 : f32 to vector<2x32xf32>
    %555 = arith.addf %554, %553 : vector<2x32xf32>
    %cst_191 = arith.constant 2.000000e+00 : f32
    %556 = vector.broadcast %cst_191 : f32 to vector<2x32xf32>
    %557 = arith.mulf %556, %550 : vector<2x32xf32>
    %558 = arith.mulf %555, %555 : vector<2x32xf32>
    %cst_192 = arith.constant 1.000000e+00 : f32
    %559 = vector.broadcast %cst_192 : f32 to vector<2x32xf32>
    %560 = arith.addf %558, %559 : vector<2x32xf32>
    %561 = tpu.reciprocal %560 {approx = true} : vector<2x32xf32> -> vector<2x32xf32>
    %562 = arith.mulf %557, %561 : vector<2x32xf32>
    %563 = arith.subf %550, %562 : vector<2x32xf32>
    %564 = arith.truncf %563 : vector<2x32xf32> to vector<2x32xbf16>
    %cst_193 = arith.constant dense<0.000000e+00> : vector<2x32xf32>
    %565 = tpu.matmul %564, %8, %cst_193 {dimension_numbers = #tpu.dot_dimension_numbers<[1], [0], [0], [1], [0, 0, 1, 1], [], []>} : vector<2x32xbf16>, vector<32x32xbf16>, vector<2x32xf32> -> vector<2x32xf32>
    %566 = vector.broadcast %9 : vector<1x32xf32> to vector<2x32xf32>
    %567 = arith.addf %565, %566 : vector<2x32xf32>
    %cst_194 = arith.constant 2.000000e+01 : f32
    %568 = vector.broadcast %cst_194 : f32 to vector<2x32xf32>
    %569 = arith.minimumf %567, %568 : vector<2x32xf32>
    %570 = math.exp %569 : vector<2x32xf32>
    %cst_195 = arith.constant 1.000000e+00 : f32
    %571 = vector.broadcast %cst_195 : f32 to vector<2x32xf32>
    %572 = arith.addf %571, %570 : vector<2x32xf32>
    %cst_196 = arith.constant 2.000000e+00 : f32
    %573 = vector.broadcast %cst_196 : f32 to vector<2x32xf32>
    %574 = arith.mulf %573, %567 : vector<2x32xf32>
    %575 = arith.mulf %572, %572 : vector<2x32xf32>
    %cst_197 = arith.constant 1.000000e+00 : f32
    %576 = vector.broadcast %cst_197 : f32 to vector<2x32xf32>
    %577 = arith.addf %575, %576 : vector<2x32xf32>
    %578 = tpu.reciprocal %577 {approx = true} : vector<2x32xf32> -> vector<2x32xf32>
    %579 = arith.mulf %574, %578 : vector<2x32xf32>
    %580 = arith.subf %567, %579 : vector<2x32xf32>
    %581 = arith.truncf %580 : vector<2x32xf32> to vector<2x32xbf16>
    %cst_198 = arith.constant dense<0.000000e+00> : vector<2x8xf32>
    %582 = tpu.matmul %581, %11, %cst_198 {dimension_numbers = #tpu.dot_dimension_numbers<[1], [0], [0], [1], [0, 0, 1, 1], [], []>} : vector<2x32xbf16>, vector<32x8xbf16>, vector<2x8xf32> -> vector<2x8xf32>
    %583 = vector.broadcast %12 : vector<1x8xf32> to vector<2x8xf32>
    %584 = arith.addf %582, %583 : vector<2x8xf32>
    %cst_199 = arith.constant 1.00347912 : f32
    %585 = vector.broadcast %cst_199 : f32 to vector<2x8xf32>
    %586 = arith.mulf %585, %527 : vector<2x8xf32>
    %cst_200 = arith.constant 0.0834889561 : f32
    %587 = vector.broadcast %cst_200 : f32 to vector<2x8xf32>
    %588 = arith.mulf %587, %584 : vector<2x8xf32>
    %589 = arith.subf %586, %588 : vector<2x8xf32>
    %cst_201 = arith.constant -1.000000e+00 : f32
    %cst_202 = arith.constant 1.000000e+00 : f32
    %590 = vector.broadcast %cst_201 : f32 to vector<2x8xf32>
    %591 = arith.maximumf %590, %589 : vector<2x8xf32>
    %592 = vector.broadcast %cst_202 : f32 to vector<2x8xf32>
    %593 = arith.minimumf %592, %591 : vector<2x8xf32>
    %cst_203 = arith.constant 0.652506053 : f32
    %594 = vector.broadcast %cst_203 : f32 to vector<2x8xf32>
    %595 = arith.mulf %594, %593 : vector<2x8xf32>
    %cst_204 = arith.constant 0.347495914 : f32
    %596 = vector.broadcast %cst_204 : f32 to vector<2x8xf32>
    %597 = arith.mulf %596, %527 : vector<2x8xf32>
    %598 = arith.addf %595, %597 : vector<2x8xf32>
    %c72_205 = arith.constant 72 : index
    %c0_206 = arith.constant 0 : index
    %599 = vector.load %arg1[%c72_205, %c0_206] : memref<96x128xf32, #tpu.memory_space<vmem>>, vector<2x8xf32>
    %600 = arith.addf %598, %599 : vector<2x8xf32>
    %c1 = arith.constant 1 : index
    %c0_207 = arith.constant 0 : index
    %601 = vector.load %arg0[%c1, %c0_207] : memref<160x128xf32, #tpu.memory_space<vmem>>, vector<1x32xf32>
    %602 = arith.truncf %600 : vector<2x8xf32> to vector<2x8xbf16>
    %cst_208 = arith.constant dense<0.000000e+00> : vector<2x32xf32>
    %603 = tpu.matmul %602, %1, %cst_208 {dimension_numbers = #tpu.dot_dimension_numbers<[1], [0], [0], [1], [0, 0, 1, 1], [], []>} : vector<2x8xbf16>, vector<8x32xbf16>, vector<2x32xf32> -> vector<2x32xf32>
    %604 = vector.broadcast %601 : vector<1x32xf32> to vector<2x32xf32>
    %605 = arith.addf %603, %604 : vector<2x32xf32>
    %606 = arith.addf %605, %16 : vector<2x32xf32>
    %cst_209 = arith.constant 2.000000e+01 : f32
    %607 = vector.broadcast %cst_209 : f32 to vector<2x32xf32>
    %608 = arith.minimumf %606, %607 : vector<2x32xf32>
    %609 = math.exp %608 : vector<2x32xf32>
    %cst_210 = arith.constant 1.000000e+00 : f32
    %610 = vector.broadcast %cst_210 : f32 to vector<2x32xf32>
    %611 = arith.addf %610, %609 : vector<2x32xf32>
    %cst_211 = arith.constant 2.000000e+00 : f32
    %612 = vector.broadcast %cst_211 : f32 to vector<2x32xf32>
    %613 = arith.mulf %612, %606 : vector<2x32xf32>
    %614 = arith.mulf %611, %611 : vector<2x32xf32>
    %cst_212 = arith.constant 1.000000e+00 : f32
    %615 = vector.broadcast %cst_212 : f32 to vector<2x32xf32>
    %616 = arith.addf %614, %615 : vector<2x32xf32>
    %617 = tpu.reciprocal %616 {approx = true} : vector<2x32xf32> -> vector<2x32xf32>
    %618 = arith.mulf %613, %617 : vector<2x32xf32>
    %619 = arith.subf %606, %618 : vector<2x32xf32>
    %620 = arith.truncf %619 : vector<2x32xf32> to vector<2x32xbf16>
    %cst_213 = arith.constant dense<0.000000e+00> : vector<2x32xf32>
    %621 = tpu.matmul %620, %5, %cst_213 {dimension_numbers = #tpu.dot_dimension_numbers<[1], [0], [0], [1], [0, 0, 1, 1], [], []>} : vector<2x32xbf16>, vector<32x32xbf16>, vector<2x32xf32> -> vector<2x32xf32>
    %622 = vector.broadcast %6 : vector<1x32xf32> to vector<2x32xf32>
    %623 = arith.addf %621, %622 : vector<2x32xf32>
    %cst_214 = arith.constant 2.000000e+01 : f32
    %624 = vector.broadcast %cst_214 : f32 to vector<2x32xf32>
    %625 = arith.minimumf %623, %624 : vector<2x32xf32>
    %626 = math.exp %625 : vector<2x32xf32>
    %cst_215 = arith.constant 1.000000e+00 : f32
    %627 = vector.broadcast %cst_215 : f32 to vector<2x32xf32>
    %628 = arith.addf %627, %626 : vector<2x32xf32>
    %cst_216 = arith.constant 2.000000e+00 : f32
    %629 = vector.broadcast %cst_216 : f32 to vector<2x32xf32>
    %630 = arith.mulf %629, %623 : vector<2x32xf32>
    %631 = arith.mulf %628, %628 : vector<2x32xf32>
    %cst_217 = arith.constant 1.000000e+00 : f32
    %632 = vector.broadcast %cst_217 : f32 to vector<2x32xf32>
    %633 = arith.addf %631, %632 : vector<2x32xf32>
    %634 = tpu.reciprocal %633 {approx = true} : vector<2x32xf32> -> vector<2x32xf32>
    %635 = arith.mulf %630, %634 : vector<2x32xf32>
    %636 = arith.subf %623, %635 : vector<2x32xf32>
    %637 = arith.truncf %636 : vector<2x32xf32> to vector<2x32xbf16>
    %cst_218 = arith.constant dense<0.000000e+00> : vector<2x32xf32>
    %638 = tpu.matmul %637, %8, %cst_218 {dimension_numbers = #tpu.dot_dimension_numbers<[1], [0], [0], [1], [0, 0, 1, 1], [], []>} : vector<2x32xbf16>, vector<32x32xbf16>, vector<2x32xf32> -> vector<2x32xf32>
    %639 = vector.broadcast %9 : vector<1x32xf32> to vector<2x32xf32>
    %640 = arith.addf %638, %639 : vector<2x32xf32>
    %cst_219 = arith.constant 2.000000e+01 : f32
    %641 = vector.broadcast %cst_219 : f32 to vector<2x32xf32>
    %642 = arith.minimumf %640, %641 : vector<2x32xf32>
    %643 = math.exp %642 : vector<2x32xf32>
    %cst_220 = arith.constant 1.000000e+00 : f32
    %644 = vector.broadcast %cst_220 : f32 to vector<2x32xf32>
    %645 = arith.addf %644, %643 : vector<2x32xf32>
    %cst_221 = arith.constant 2.000000e+00 : f32
    %646 = vector.broadcast %cst_221 : f32 to vector<2x32xf32>
    %647 = arith.mulf %646, %640 : vector<2x32xf32>
    %648 = arith.mulf %645, %645 : vector<2x32xf32>
    %cst_222 = arith.constant 1.000000e+00 : f32
    %649 = vector.broadcast %cst_222 : f32 to vector<2x32xf32>
    %650 = arith.addf %648, %649 : vector<2x32xf32>
    %651 = tpu.reciprocal %650 {approx = true} : vector<2x32xf32> -> vector<2x32xf32>
    %652 = arith.mulf %647, %651 : vector<2x32xf32>
    %653 = arith.subf %640, %652 : vector<2x32xf32>
    %654 = arith.truncf %653 : vector<2x32xf32> to vector<2x32xbf16>
    %cst_223 = arith.constant dense<0.000000e+00> : vector<2x8xf32>
    %655 = tpu.matmul %654, %11, %cst_223 {dimension_numbers = #tpu.dot_dimension_numbers<[1], [0], [0], [1], [0, 0, 1, 1], [], []>} : vector<2x32xbf16>, vector<32x8xbf16>, vector<2x8xf32> -> vector<2x8xf32>
    %656 = vector.broadcast %12 : vector<1x8xf32> to vector<2x8xf32>
    %657 = arith.addf %655, %656 : vector<2x8xf32>
    %cst_224 = arith.constant 1.00120759 : f32
    %658 = vector.broadcast %cst_224 : f32 to vector<2x8xf32>
    %659 = arith.mulf %658, %600 : vector<2x8xf32>
    %cst_225 = arith.constant 0.0491602458 : f32
    %660 = vector.broadcast %cst_225 : f32 to vector<2x8xf32>
    %661 = arith.mulf %660, %657 : vector<2x8xf32>
    %662 = arith.subf %659, %661 : vector<2x8xf32>
    %cst_226 = arith.constant -1.000000e+00 : f32
    %cst_227 = arith.constant 1.000000e+00 : f32
    %663 = vector.broadcast %cst_226 : f32 to vector<2x8xf32>
    %664 = arith.maximumf %663, %662 : vector<2x8xf32>
    %665 = vector.broadcast %cst_227 : f32 to vector<2x8xf32>
    %666 = arith.minimumf %665, %664 : vector<2x8xf32>
    %cst_228 = arith.constant 0.95856589 : f32
    %667 = vector.broadcast %cst_228 : f32 to vector<2x8xf32>
    %668 = arith.mulf %667, %666 : vector<2x8xf32>
    %cst_229 = arith.constant 4.143740e-02 : f32
    %669 = vector.broadcast %cst_229 : f32 to vector<2x8xf32>
    %670 = arith.mulf %669, %600 : vector<2x8xf32>
    %671 = arith.addf %668, %670 : vector<2x8xf32>
    %c80_230 = arith.constant 80 : index
    %c0_231 = arith.constant 0 : index
    %672 = vector.load %arg1[%c80_230, %c0_231] : memref<96x128xf32, #tpu.memory_space<vmem>>, vector<2x8xf32>
    %673 = arith.addf %671, %672 : vector<2x8xf32>
    %c0_232 = arith.constant 0 : index
    %c0_233 = arith.constant 0 : index
    %674 = vector.load %arg0[%c0_232, %c0_233] : memref<160x128xf32, #tpu.memory_space<vmem>>, vector<1x32xf32>
    %675 = arith.truncf %673 : vector<2x8xf32> to vector<2x8xbf16>
    %cst_234 = arith.constant dense<0.000000e+00> : vector<2x32xf32>
    %676 = tpu.matmul %675, %1, %cst_234 {dimension_numbers = #tpu.dot_dimension_numbers<[1], [0], [0], [1], [0, 0, 1, 1], [], []>} : vector<2x8xbf16>, vector<8x32xbf16>, vector<2x32xf32> -> vector<2x32xf32>
    %677 = vector.broadcast %674 : vector<1x32xf32> to vector<2x32xf32>
    %678 = arith.addf %676, %677 : vector<2x32xf32>
    %679 = arith.addf %678, %16 : vector<2x32xf32>
    %cst_235 = arith.constant 2.000000e+01 : f32
    %680 = vector.broadcast %cst_235 : f32 to vector<2x32xf32>
    %681 = arith.minimumf %679, %680 : vector<2x32xf32>
    %682 = math.exp %681 : vector<2x32xf32>
    %cst_236 = arith.constant 1.000000e+00 : f32
    %683 = vector.broadcast %cst_236 : f32 to vector<2x32xf32>
    %684 = arith.addf %683, %682 : vector<2x32xf32>
    %cst_237 = arith.constant 2.000000e+00 : f32
    %685 = vector.broadcast %cst_237 : f32 to vector<2x32xf32>
    %686 = arith.mulf %685, %679 : vector<2x32xf32>
    %687 = arith.mulf %684, %684 : vector<2x32xf32>
    %cst_238 = arith.constant 1.000000e+00 : f32
    %688 = vector.broadcast %cst_238 : f32 to vector<2x32xf32>
    %689 = arith.addf %687, %688 : vector<2x32xf32>
    %690 = tpu.reciprocal %689 {approx = true} : vector<2x32xf32> -> vector<2x32xf32>
    %691 = arith.mulf %686, %690 : vector<2x32xf32>
    %692 = arith.subf %679, %691 : vector<2x32xf32>
    %693 = arith.truncf %692 : vector<2x32xf32> to vector<2x32xbf16>
    %cst_239 = arith.constant dense<0.000000e+00> : vector<2x32xf32>
    %694 = tpu.matmul %693, %5, %cst_239 {dimension_numbers = #tpu.dot_dimension_numbers<[1], [0], [0], [1], [0, 0, 1, 1], [], []>} : vector<2x32xbf16>, vector<32x32xbf16>, vector<2x32xf32> -> vector<2x32xf32>
    %695 = vector.broadcast %6 : vector<1x32xf32> to vector<2x32xf32>
    %696 = arith.addf %694, %695 : vector<2x32xf32>
    %cst_240 = arith.constant 2.000000e+01 : f32
    %697 = vector.broadcast %cst_240 : f32 to vector<2x32xf32>
    %698 = arith.minimumf %696, %697 : vector<2x32xf32>
    %699 = math.exp %698 : vector<2x32xf32>
    %cst_241 = arith.constant 1.000000e+00 : f32
    %700 = vector.broadcast %cst_241 : f32 to vector<2x32xf32>
    %701 = arith.addf %700, %699 : vector<2x32xf32>
    %cst_242 = arith.constant 2.000000e+00 : f32
    %702 = vector.broadcast %cst_242 : f32 to vector<2x32xf32>
    %703 = arith.mulf %702, %696 : vector<2x32xf32>
    %704 = arith.mulf %701, %701 : vector<2x32xf32>
    %cst_243 = arith.constant 1.000000e+00 : f32
    %705 = vector.broadcast %cst_243 : f32 to vector<2x32xf32>
    %706 = arith.addf %704, %705 : vector<2x32xf32>
    %707 = tpu.reciprocal %706 {approx = true} : vector<2x32xf32> -> vector<2x32xf32>
    %708 = arith.mulf %703, %707 : vector<2x32xf32>
    %709 = arith.subf %696, %708 : vector<2x32xf32>
    %710 = arith.truncf %709 : vector<2x32xf32> to vector<2x32xbf16>
    %cst_244 = arith.constant dense<0.000000e+00> : vector<2x32xf32>
    %711 = tpu.matmul %710, %8, %cst_244 {dimension_numbers = #tpu.dot_dimension_numbers<[1], [0], [0], [1], [0, 0, 1, 1], [], []>} : vector<2x32xbf16>, vector<32x32xbf16>, vector<2x32xf32> -> vector<2x32xf32>
    %712 = vector.broadcast %9 : vector<1x32xf32> to vector<2x32xf32>
    %713 = arith.addf %711, %712 : vector<2x32xf32>
    %cst_245 = arith.constant 2.000000e+01 : f32
    %714 = vector.broadcast %cst_245 : f32 to vector<2x32xf32>
    %715 = arith.minimumf %713, %714 : vector<2x32xf32>
    %716 = math.exp %715 : vector<2x32xf32>
    %cst_246 = arith.constant 1.000000e+00 : f32
    %717 = vector.broadcast %cst_246 : f32 to vector<2x32xf32>
    %718 = arith.addf %717, %716 : vector<2x32xf32>
    %cst_247 = arith.constant 2.000000e+00 : f32
    %719 = vector.broadcast %cst_247 : f32 to vector<2x32xf32>
    %720 = arith.mulf %719, %713 : vector<2x32xf32>
    %721 = arith.mulf %718, %718 : vector<2x32xf32>
    %cst_248 = arith.constant 1.000000e+00 : f32
    %722 = vector.broadcast %cst_248 : f32 to vector<2x32xf32>
    %723 = arith.addf %721, %722 : vector<2x32xf32>
    %724 = tpu.reciprocal %723 {approx = true} : vector<2x32xf32> -> vector<2x32xf32>
    %725 = arith.mulf %720, %724 : vector<2x32xf32>
    %726 = arith.subf %713, %725 : vector<2x32xf32>
    %727 = arith.truncf %726 : vector<2x32xf32> to vector<2x32xbf16>
    %cst_249 = arith.constant dense<0.000000e+00> : vector<2x8xf32>
    %728 = tpu.matmul %727, %11, %cst_249 {dimension_numbers = #tpu.dot_dimension_numbers<[1], [0], [0], [1], [0, 0, 1, 1], [], []>} : vector<2x32xbf16>, vector<32x8xbf16>, vector<2x8xf32> -> vector<2x8xf32>
    %729 = vector.broadcast %12 : vector<1x8xf32> to vector<2x8xf32>
    %730 = arith.addf %728, %729 : vector<2x8xf32>
    %cst_250 = arith.constant 1.000050e+00 : f32
    %731 = vector.broadcast %cst_250 : f32 to vector<2x8xf32>
    %732 = arith.mulf %731, %673 : vector<2x8xf32>
    %cst_251 = arith.constant 0.0100008296 : f32
    %733 = vector.broadcast %cst_251 : f32 to vector<2x8xf32>
    %734 = arith.mulf %733, %730 : vector<2x8xf32>
    %735 = arith.subf %732, %734 : vector<2x8xf32>
    %cst_252 = arith.constant -1.000000e+00 : f32
    %cst_253 = arith.constant 1.000000e+00 : f32
    %736 = vector.broadcast %cst_252 : f32 to vector<2x8xf32>
    %737 = arith.maximumf %736, %735 : vector<2x8xf32>
    %738 = vector.broadcast %cst_253 : f32 to vector<2x8xf32>
    %739 = arith.minimumf %738, %737 : vector<2x8xf32>
    %cst_254 = arith.constant 0.99983406 : f32
    %740 = vector.broadcast %cst_254 : f32 to vector<2x8xf32>
    %741 = arith.mulf %740, %739 : vector<2x8xf32>
    %cst_255 = arith.constant 0.000000e+00 : f32
    %742 = vector.broadcast %cst_255 : f32 to vector<2x8xf32>
    %743 = arith.mulf %742, %673 : vector<2x8xf32>
    %744 = arith.addf %741, %743 : vector<2x8xf32>
    %c88 = arith.constant 88 : index
    %c0_256 = arith.constant 0 : index
    %745 = vector.load %arg1[%c88, %c0_256] : memref<96x128xf32, #tpu.memory_space<vmem>>, vector<2x8xf32>
    %746 = arith.addf %744, %745 : vector<2x8xf32>
    %cst_257 = arith.constant -1.000000e+00 : f32
    %cst_258 = arith.constant 1.000000e+00 : f32
    %747 = vector.broadcast %cst_257 : f32 to vector<2x8xf32>
    %748 = arith.maximumf %747, %746 : vector<2x8xf32>
    %749 = vector.broadcast %cst_258 : f32 to vector<2x8xf32>
    %750 = arith.minimumf %749, %748 : vector<2x8xf32>
    %c0_259 = arith.constant 0 : index
    %c0_260 = arith.constant 0 : index
    %751 = vector.load %arg2[%c0_259, %c0_260] : memref<2x8xf32, #tpu.memory_space<vmem>>, vector<2x8xf32>
    tpu.vector_store %arg2[%c0_259, %c0_260], %750 {strides = array<i32>} : memref<2x8xf32, #tpu.memory_space<vmem>>, vector<2x8xf32>,
    return
  }
}

</mosaic_0001>

<bundles_post_ra>
// kernel: sample.1
= control target key start
LH: loop header
LB: loop body
LE: loop exit
PB: predicated region body
PF: predicated region fallthrough
CT: control target
= control target key end

     0   :  { %vm96_vm0 = vcmask 1043456   ;;  %v2973_v3 = vmov 0.0   ;;  %vm2974_vm1 = vmmov 0   ;;  %s3514_s0 = inlined_call_operand.vmem [shape: f32[160,128], index: 0, kind: input, shape index: {}]   ;;  %s3515_s1 = inlined_call_operand.vmem [shape: f32[96,128], index: 1, kind: input, shape index: {}]   ;;  %s3516_s2 = inlined_call_operand.hbm [shape: f32[2,8], index: 2, kind: output, shape index: {}]  }
   0x1   :  { %v15_v0 = vld [vmem:[%s3514_s0 + $0x18] sm:$0xff]  ;;  %v16_v1 = vld [vmem:[%s3514_s0 + $0x20] sm:$0xff]  ;;  %v13_v2 = vld [vmem:[%s3514_s0 + $0x10] sm:$0xff]  ;;  %2519 = vmatprep.subr.bf16.mxu0 %v2973_v3  ;;  %2525 = vmatprep.subr.bf16.mxu1 %v2973_v3 }
   0x2   :  { %v17_v4 = vpack.c.bf16 %v16_v1, %v15_v0  ;;  %v14_v5 = vpack.c.bf16 %v13_v2, %v13_v2  ;;  %v40_v6 = vld [vmem:[%s3515_s1 + $0x8] sm:$0x3]  ;;  %v3008_v7 = vld [vmem:[%s3515_s1] sm:$0x3]  ;;  %2521 = vmatprep.mubr.msk.bf16.mxu0 %vm2974_vm1, %v2973_v3  ;;  %2527 = vmatprep.mubr.msk.bf16.mxu1 %vm2974_vm1, %v2973_v3 }
   0x3   :  { %v41_v8 = vpack.c.bf16 %v40_v6, %v40_v6 }
   0x4   :  { %7 = vsyncpa [#allocation3], 0  ;;  %2520 = vmatpush3.bf16.msra.mxu0 %v17_v4  ;;  %v3014_v9 = vsel %vm96_vm0, %v14_v5, 0  ;;  %vm42_vm2 = vcmask 130048   ;;  %v87_v10 = vpack.c.bf16 %v3008_v7, %v3008_v7  ;;  %vm92_vm3 = vcmask 64512   ;;  %v20_v11 = vld [vmem:[%s3514_s0 + $0x38] sm:$0xff] }
   0x5   :  { %2526 = vmatpush3.bf16.msra.mxu1 %v3014_v9  ;;  %2531 = vmatprep.subr.bf16.mxu0 %v2973_v3  ;;  %v21_v12 = vld [vmem:[%s3514_s0 + $0x40] sm:$0xff]  ;;  %v18_v14 = vld [vmem:[%s3514_s0 + $0x28] sm:$0xff]  ;;  %v19_v15 = vld [vmem:[%s3514_s0 + $0x30] sm:$0xff]  ;;  %vm156_vm4 = vcmask 261120   ;;  %s2975_s10 = smov [#allocation2]   ;;  %vm2326_vm5 = vcmask 58368  }
   0x6   :  { %2539 = vmatprep.subr.bf16.mxu1 %v2973_v3  ;;  %v3032_v13 = vpack.c.bf16 %v21_v12, %v20_v11  ;;  %v3042_v16 = vpack.c.bf16 %v19_v15, %v18_v14  ;;  %v2343_v17 = vld [vmem:[%s3514_s0 + $0x9] ss:$0 sm:$0xff]  ;;  %v27_v39 = vld [vmem:[%s3514_s0 + $0x60] sm:$0xff]  ;;  %v25_v42 = vld [vmem:[%s3514_s0 + $0x50] sm:$0xff]  ;;  %s2334_s11 = sshll.u32 %s2975_s10, 4  ;;  %s2335_s11 = int_to_ptr.vmem [resolvable:$true] %s2334_s11 }
   0x7   :  { %2522 = vmatmul.mubr.msk.bf16.vlgmr.msra.gmra.mxu0 %vm42_vm2, %v41_v8  ;;  %v28_v40 = vld [vmem:[%s3514_s0 + $0x68] sm:$0xff]  ;;  %v26_v43 = vld [vmem:[%s3514_s0 + $0x58] sm:$0xff]  ;;  %v35_v63 = vld [vmem:[%s3514_s0 + $0x90] sm:$0xff]  ;;  %s2951_s12 = scalar_lea.vmem %s2335_s11, 32  ;;  %p2956_p1 = scmp.lt.s32.totalorder %s2335_s11, %s2335_s11 }
   0x8   :  { %2528 = vmatmul.mubr.msk.bf16.vlgmr.msra.gmra.mxu1 %vm92_vm3, %v87_v10  ;;  %2535 = vmatprep.mubr.msk.bf16.mxu0 %vm2974_vm1, %v2973_v3  ;;  %v3061_v41 = vpack.c.bf16 %v28_v40, %v27_v39  ;;  %v3071_v44 = vpack.c.bf16 %v26_v43, %v25_v42  ;;  %v3078_v45 = vld [vmem:[%s3514_s0 + $0x48] ss:$0 sm:$0xff]  ;;  %v32_v1 = vld [vmem:[%s3514_s0 + $0x78] sm:$0xff]  ;;  %v33_v2 = vld [vmem:[%s3514_s0 + $0x80] sm:$0xff]  ;;  %p2952_p0 = scmp.ne.s32.totalorder %s2335_s11, %s2951_s12  ;;  %p2957_p2 = scmp.lt.s32.totalorder %s2951_s12, %s2951_s12 }
   0x9   :  { %2543 = vmatprep.mubr.msk.bf16.mxu1 %vm2974_vm1, %v2973_v3  ;;  %2532 = vmatpush3.bf16.msra.mxu0 %v3032_v13  ;;  %v34_v62 = vld [vmem:[%s3514_s0 + $0x88] sm:$0xff]  ;;  %v3102_v4 = vpack.c.bf16 %v33_v2, %v32_v1  ;;  %v3109_v5 = vld [vmem:[%s3514_s0 + $0x70] ss:$0 sm:$0xff] }
   0xa   :  { %2533 = vmatprep.subr.bf16.mxu0 %v2973_v3  ;;  %2540 = vmatpush3.bf16.msra.mxu1 %v3061_v41  ;;  %v3092_v0 = vpack.c.bf16 %v35_v63, %v34_v62  ;;  %v324_v39 = vld [vmem:[%s3515_s1 + $0x10] sm:$0x3]  ;;  %p2958_p3 = por %p2957_p2, %p2956_p1 }
   0xb   :  { %2541 = vmatprep.subr.bf16.mxu1 %v2973_v3 }
   0xc   :  { %p2959_p4 = pnand %p2958_p3, %p2952_p0 }
   0xd   :  { %2534 = vmatpush3.bf16.msra.mxu0 %v3042_v16 }
   0xe   :  { %2547 = vmatprep.subr.bf16.mxu0 %v2973_v3  ;;  %2542 = vmatpush3.bf16.msra.mxu1 %v3071_v44 }
   0xf   :  { %2555 = vmatprep.subr.bf16.mxu1 %v2973_v3 }
  0xc7   :  { %v3049_v18 = vpop.f32.mrf.mxu0 }
  0xc8   :  { %v134_v19 = vpop.f32.mrf.mxu1 }
  0xc9   :  { %v135_v20 = vadd.f32 %v2343_v17, %v134_v19  ;;  %v2523_v21 = vpop.f32.mrf.mxu0 }
  0xca   :  { %v2529_v22 = vpop.f32.mrf.mxu1 }
  0xcb   :  { %v140_v23 = vadd.f32 %v135_v20, %v3049_v18  ;;  %v83_v24 = vpop.f32.mrf.mxu0 }
  0xcc   :  { %v137_v25 = vpop.f32.mrf.mxu1 }
  0xcd   :  { %v141_v26 = vmin.f32 %v140_v23, 20.0  ;;  %v2524_v27 = vpop.f32.mrf.mxu0  ;;  %v145_v34 = vmul.f32 2.0, %v140_v23 }
  0xce   :  { %v2530_v28 = vpop.f32.mrf.mxu1  ;;  %v3122_v27 = vld [vmem:[%s3514_s0 + $0x98] ss:$0 sm:$0xff] }
  0xcf   :  { %v142_v29 = vmul.f32 1.442695, %v141_v26 }
  0xd1   :  { %2828 = vpow2.f32 %v142_v29 }
  0xde   :  { %v2829_v30 = vpop.eup %2828 }
  0xdf   :  { %v144_v31 = vadd.f32 1.0, %v2829_v30  ;;  %v316_v30 = vmul.f32 1.0519096, %v3008_v7 }
  0xe1   :  { %v146_v32 = vmul.f32 %v144_v31, %v144_v31 }
  0xe3   :  { %v147_v33 = vadd.f32 1.0, %v146_v32 }
  0xe5   :  { %2830 = vrcp.f32 %v147_v33 }
  0xf2   :  { %v2831_v35 = vpop.eup %2830 }
  0xf3   :  { %v149_v36 = vmul.f32 %v2831_v35, %v145_v34 }
  0xf5   :  { %v150_v37 = vsub.f32 %v140_v23, %v149_v36 }
  0xf7   :  { %v151_v38 = vpack.c.bf16 %v150_v37, %v150_v37  ;;  %v322_v37 = vmul.f32 0.80027395, %v3008_v7  ;;  %v2352_v7 = vld [vmem:[%s3514_s0 + $0x8] ss:$0 sm:$0xff] }
  0xf9   :  { %2536 = vmatmul.mubr.msk.bf16.vlgmr.msra.gmra.mxu0 %vm156_vm4, %v151_v38 }
  0xfa   :  { %2551 = vmatprep.mubr.msk.bf16.mxu0 %vm2974_vm1, %v2973_v3  ;;  %2548 = vmatpush3.bf16.msra.mxu0 %v3092_v0 }
  0xfb   :  { %2549 = vmatprep.subr.bf16.mxu0 %v2973_v3 }
  0xfe   :  { %2550 = vmatpush3.bf16.msra.mxu0 %v3102_v4 }
  0xff   :  { %2561 = vmatprep.subr.bf16.mxu0 %v2973_v3 }
 0x1b9   :  { %v194_v46 = vpop.f32.mrf.mxu0 }
 0x1ba   :  { %v195_v47 = vadd.f32 %v3078_v45, %v194_v46 }
 0x1bb   :  { %v2537_v48 = vpop.f32.mrf.mxu0 }
 0x1bc   :  { %v200_v49 = vmin.f32 %v195_v47, 20.0  ;;  %v204_v57 = vmul.f32 2.0, %v195_v47 }
 0x1bd   :  { %v197_v50 = vpop.f32.mrf.mxu0 }
 0x1be   :  { %v201_v51 = vmul.f32 1.442695, %v200_v49 }
 0x1bf   :  { %v2538_v52 = vpop.f32.mrf.mxu0 }
 0x1c0   :  { %2832 = vpow2.f32 %v201_v51 }
 0x1cd   :  { %v2833_v53 = vpop.eup %2832 }
 0x1ce   :  { %v203_v54 = vadd.f32 1.0, %v2833_v53 }
 0x1d0   :  { %v205_v55 = vmul.f32 %v203_v54, %v203_v54 }
 0x1d2   :  { %v206_v56 = vadd.f32 1.0, %v205_v55 }
 0x1d4   :  { %2834 = vrcp.f32 %v206_v56 }
 0x1e1   :  { %v2835_v58 = vpop.eup %2834 }
 0x1e2   :  { %v208_v59 = vmul.f32 %v2835_v58, %v204_v57 }
 0x1e4   :  { %v209_v60 = vsub.f32 %v195_v47, %v208_v59 }
 0x1e6   :  { %v210_v61 = vpack.c.bf16 %v209_v60, %v209_v60 }
 0x1e8   :  { %2544 = vmatmul.mubr.msk.bf16.vlgmr.msra.gmra.mxu1 %vm156_vm4, %v210_v61 }
 0x1e9   :  { %2556 = vmatpush3.bf16.msra.mxu1 %v3014_v9  ;;  %2557 = vmatprep.mubr.msk.bf16.mxu1 %vm2974_vm1, %v2973_v3 }
 0x1ea   :  { %2569 = vmatprep.subr.bf16.mxu1 %v2973_v3 }
 0x2a8   :  { %v252_v6 = vpop.f32.mrf.mxu1 }
 0x2a9   :  { %v253_v8 = vadd.f32 %v3109_v5, %v252_v6 }
 0x2aa   :  { %v2545_v10 = vpop.f32.mrf.mxu1 }
 0x2ab   :  { %v258_v11 = vmin.f32 %v253_v8, 20.0  ;;  %v262_v22 = vmul.f32 2.0, %v253_v8 }
 0x2ac   :  { %v255_v12 = vpop.f32.mrf.mxu1 }
 0x2ad   :  { %v259_v14 = vmul.f32 1.442695, %v258_v11 }
 0x2ae   :  { %v2546_v15 = vpop.f32.mrf.mxu1 }
 0x2af   :  { %2836 = vpow2.f32 %v259_v14 }
 0x2bc   :  { %v2837_v17 = vpop.eup %2836 }
 0x2bd   :  { %v261_v19 = vadd.f32 1.0, %v2837_v17 }
 0x2bf   :  { %v263_v20 = vmul.f32 %v261_v19, %v261_v19 }
 0x2c1   :  { %v264_v21 = vadd.f32 1.0, %v263_v20 }
 0x2c3   :  { %2838 = vrcp.f32 %v264_v21 }
 0x2d0   :  { %v2839_v23 = vpop.eup %2838 }
 0x2d1   :  { %v266_v24 = vmul.f32 %v2839_v23, %v262_v22 }
 0x2d3   :  { %v267_v25 = vsub.f32 %v253_v8, %v266_v24 }
 0x2d5   :  { %v268_v26 = vpack.c.bf16 %v267_v25, %v267_v25 }
 0x2d7   :  { %2552 = vmatmul.mubr.msk.bf16.vlgmr.msra.gmra.mxu0 %vm156_vm4, %v268_v26 }
 0x2d8   :  { %2562 = vmatpush3.bf16.msra.mxu0 %v3032_v13  ;;  %2565 = vmatprep.mubr.msk.bf16.mxu0 %vm2974_vm1, %v2973_v3 }
 0x2d9   :  { %2563 = vmatprep.subr.bf16.mxu0 %v2973_v3 }
 0x2dc   :  { %2564 = vmatpush3.bf16.msra.mxu0 %v3042_v16 }
 0x2dd   :  { %2577 = vmatprep.subr.bf16.mxu0 %v2973_v3 }
 0x397   :  { %v310_v28 = vpop.f32.mrf.mxu0 }
 0x398   :  { %v311_v29 = vadd.f32 %v3122_v27, %v310_v28 }
 0x399   :  { %v2553_v31 = vpop.f32.mrf.mxu0 }
 0x39a   :  { %v317_v32 = vmul.f32 0.32636425, %v311_v29 }
 0x39b   :  { %v313_v33 = vpop.f32.mrf.mxu0 }
 0x39c   :  { %v318_v34 = vsub.f32 %v316_v30, %v317_v32 }
 0x39d   :  { %v2554_v35 = vpop.f32.mrf.mxu0 }
 0x39e   :  { %v2351_v36 = vclamps-f32 %v318_v34, 1.0 }
 0x3a0   :  { %v321_v38 = vmul.f32 0.19952175, %v2351_v36 }
 0x3a2   :  { %v323_v40 = vadd.f32 %v322_v37, %v321_v38 }
 0x3a4   :  { %v3130_v42 = vadd.f32 %v324_v39, %v323_v40 }
 0x3a6   :  { %v327_v43 = vpack.c.bf16 %v3130_v42, %v3130_v42 }
 0x3a8   :  { %2558 = vmatmul.mubr.msk.bf16.vlgmr.msra.gmra.mxu1 %vm92_vm3, %v327_v43 }
 0x3a9   :  { %2570 = vmatpush3.bf16.msra.mxu1 %v3061_v41  ;;  %2573 = vmatprep.mubr.msk.bf16.mxu1 %vm2974_vm1, %v2973_v3 }
 0x3aa   :  { %2571 = vmatprep.subr.bf16.mxu1 %v2973_v3 }
 0x3ad   :  { %2572 = vmatpush3.bf16.msra.mxu1 %v3071_v44 }
 0x3ae   :  { %2585 = vmatprep.subr.bf16.mxu1 %v2973_v3 }
 0x468   :  { %v369_v46 = vpop.f32.mrf.mxu1 }
 0x469   :  { %v370_v47 = vadd.f32 %v2352_v7, %v369_v46 }
 0x46a   :  { %v2559_v48 = vpop.f32.mrf.mxu1 }
 0x46b   :  { %v375_v49 = vadd.f32 %v370_v47, %v3049_v18  ;;  %v538_v47 = vmul.f32 1.0413373, %v3130_v42 }
 0x46c   :  { %v372_v50 = vpop.f32.mrf.mxu1 }
 0x46d   :  { %v376_v51 = vmin.f32 %v375_v49, 20.0  ;;  %v380_v58 = vmul.f32 2.0, %v375_v49 }
 0x46e   :  { %v2560_v52 = vpop.f32.mrf.mxu1 }
 0x46f   :  { %v377_v53 = vmul.f32 1.442695, %v376_v51 }
 0x471   :  { %2840 = vpow2.f32 %v377_v53 }
 0x47e   :  { %v2841_v54 = vpop.eup %2840 }
 0x47f   :  { %v379_v55 = vadd.f32 1.0, %v2841_v54  ;;  %v544_v54 = vmul.f32 0.778355, %v3130_v42  ;;  %v2358_v42 = vld [vmem:[%s3514_s0 + $0x7] ss:$0 sm:$0xff] }
 0x481   :  { %v381_v56 = vmul.f32 %v379_v55, %v379_v55  ;;  %v546_v55 = vld [vmem:[%s3515_s1 + $0x18] sm:$0x3] }
 0x483   :  { %v382_v57 = vadd.f32 1.0, %v381_v56 }
 0x485   :  { %2842 = vrcp.f32 %v382_v57 }
 0x492   :  { %v2843_v59 = vpop.eup %2842 }
 0x493   :  { %v384_v60 = vmul.f32 %v2843_v59, %v380_v58 }
 0x495   :  { %v385_v61 = vsub.f32 %v375_v49, %v384_v60 }
 0x497   :  { %v386_v62 = vpack.c.bf16 %v385_v61, %v385_v61 }
 0x499   :  { %2566 = vmatmul.mubr.msk.bf16.vlgmr.msra.gmra.mxu0 %vm156_vm4, %v386_v62 }
 0x49a   :  { %2578 = vmatpush3.bf16.msra.mxu0 %v3092_v0  ;;  %2581 = vmatprep.mubr.msk.bf16.mxu0 %vm2974_vm1, %v2973_v3 }
 0x49b   :  { %2579 = vmatprep.subr.bf16.mxu0 %v2973_v3 }
 0x49e   :  { %2580 = vmatpush3.bf16.msra.mxu0 %v3102_v4 }
 0x49f   :  { %2591 = vmatprep.subr.bf16.mxu0 %v2973_v3 }
 0x559   :  { %v424_v63 = vpop.f32.mrf.mxu0 }
 0x55a   :  { %v425_v1 = vadd.f32 %v3078_v45, %v424_v63 }
 0x55b   :  { %v2567_v2 = vpop.f32.mrf.mxu0 }
 0x55c   :  { %v430_v6 = vmin.f32 %v425_v1, 20.0  ;;  %v434_v19 = vmul.f32 2.0, %v425_v1 }
 0x55d   :  { %v427_v8 = vpop.f32.mrf.mxu0 }
 0x55e   :  { %v431_v10 = vmul.f32 1.442695, %v430_v6 }
 0x55f   :  { %v2568_v11 = vpop.f32.mrf.mxu0 }
 0x560   :  { %2844 = vpow2.f32 %v431_v10 }
 0x56d   :  { %v2845_v12 = vpop.eup %2844 }
 0x56e   :  { %v433_v14 = vadd.f32 1.0, %v2845_v12 }
 0x570   :  { %v435_v15 = vmul.f32 %v433_v14, %v433_v14 }
 0x572   :  { %v436_v17 = vadd.f32 1.0, %v435_v15 }
 0x574   :  { %2846 = vrcp.f32 %v436_v17 }
 0x581   :  { %v2847_v20 = vpop.eup %2846 }
 0x582   :  { %v438_v21 = vmul.f32 %v2847_v20, %v434_v19 }
 0x584   :  { %v439_v22 = vsub.f32 %v425_v1, %v438_v21 }
 0x586   :  { %v440_v23 = vpack.c.bf16 %v439_v22, %v439_v22 }
 0x588   :  { %2574 = vmatmul.mubr.msk.bf16.vlgmr.msra.gmra.mxu1 %vm156_vm4, %v440_v23 }
 0x589   :  { %2586 = vmatpush3.bf16.msra.mxu1 %v3014_v9  ;;  %2587 = vmatprep.mubr.msk.bf16.mxu1 %vm2974_vm1, %v2973_v3 }
 0x58a   :  { %2599 = vmatprep.subr.bf16.mxu1 %v2973_v3 }
 0x648   :  { %v478_v24 = vpop.f32.mrf.mxu1 }
 0x649   :  { %v479_v25 = vadd.f32 %v3109_v5, %v478_v24 }
 0x64a   :  { %v2575_v26 = vpop.f32.mrf.mxu1 }
 0x64b   :  { %v484_v28 = vmin.f32 %v479_v25, 20.0  ;;  %v488_v36 = vmul.f32 2.0, %v479_v25 }
 0x64c   :  { %v481_v29 = vpop.f32.mrf.mxu1 }
 0x64d   :  { %v485_v30 = vmul.f32 1.442695, %v484_v28 }
 0x64e   :  { %v2576_v31 = vpop.f32.mrf.mxu1 }
 0x64f   :  { %2848 = vpow2.f32 %v485_v30 }
 0x65c   :  { %v2849_v32 = vpop.eup %2848 }
 0x65d   :  { %v487_v33 = vadd.f32 1.0, %v2849_v32 }
 0x65f   :  { %v489_v34 = vmul.f32 %v487_v33, %v487_v33 }
 0x661   :  { %v490_v35 = vadd.f32 1.0, %v489_v34 }
 0x663   :  { %2850 = vrcp.f32 %v490_v35 }
 0x670   :  { %v2851_v37 = vpop.eup %2850 }
 0x671   :  { %v492_v38 = vmul.f32 %v2851_v37, %v488_v36 }
 0x673   :  { %v493_v39 = vsub.f32 %v479_v25, %v492_v38 }
 0x675   :  { %v494_v40 = vpack.c.bf16 %v493_v39, %v493_v39 }
 0x677   :  { %2582 = vmatmul.mubr.msk.bf16.vlgmr.msra.gmra.mxu0 %vm156_vm4, %v494_v40 }
 0x678   :  { %2592 = vmatpush3.bf16.msra.mxu0 %v3032_v13  ;;  %2595 = vmatprep.mubr.msk.bf16.mxu0 %vm2974_vm1, %v2973_v3 }
 0x679   :  { %2593 = vmatprep.subr.bf16.mxu0 %v2973_v3 }
 0x67c   :  { %2594 = vmatpush3.bf16.msra.mxu0 %v3042_v16 }
 0x67d   :  { %2607 = vmatprep.subr.bf16.mxu0 %v2973_v3 }
 0x737   :  { %v532_v43 = vpop.f32.mrf.mxu0 }
 0x738   :  { %v533_v7 = vadd.f32 %v3122_v27, %v532_v43 }
 0x739   :  { %v2583_v46 = vpop.f32.mrf.mxu0 }
 0x73a   :  { %v539_v48 = vmul.f32 0.29048815, %v533_v7 }
 0x73b   :  { %v535_v49 = vpop.f32.mrf.mxu0 }
 0x73c   :  { %v540_v50 = vsub.f32 %v538_v47, %v539_v48 }
 0x73d   :  { %v2584_v51 = vpop.f32.mrf.mxu0 }
 0x73e   :  { %v2357_v52 = vclamps-f32 %v540_v50, 1.0 }
 0x740   :  { %v543_v53 = vmul.f32 0.22150372, %v2357_v52 }
 0x742   :  { %v545_v56 = vadd.f32 %v544_v54, %v543_v53 }
 0x744   :  { %v3172_v57 = vadd.f32 %v546_v55, %v545_v56 }
 0x746   :  { %v549_v58 = vpack.c.bf16 %v3172_v57, %v3172_v57 }
 0x748   :  { %2588 = vmatmul.mubr.msk.bf16.vlgmr.msra.gmra.mxu1 %vm92_vm3, %v549_v58 }
 0x749   :  { %2600 = vmatpush3.bf16.msra.mxu1 %v3061_v41  ;;  %2603 = vmatprep.mubr.msk.bf16.mxu1 %vm2974_vm1, %v2973_v3 }
 0x74a   :  { %2601 = vmatprep.subr.bf16.mxu1 %v2973_v3 }
 0x74d   :  { %2602 = vmatpush3.bf16.msra.mxu1 %v3071_v44 }
 0x74e   :  { %2615 = vmatprep.subr.bf16.mxu1 %v2973_v3 }
 0x808   :  { %v591_v59 = vpop.f32.mrf.mxu1 }
 0x809   :  { %v592_v60 = vadd.f32 %v2358_v42, %v591_v59 }
 0x80a   :  { %v2589_v61 = vpop.f32.mrf.mxu1 }
 0x80b   :  { %v597_v62 = vadd.f32 %v592_v60, %v3049_v18  ;;  %v760_v60 = vmul.f32 1.0320337, %v3172_v57 }
 0x80c   :  { %v594_v63 = vpop.f32.mrf.mxu1 }
 0x80d   :  { %v598_v1 = vmin.f32 %v597_v62, 20.0  ;;  %v602_v14 = vmul.f32 2.0, %v597_v62 }
 0x80e   :  { %v2590_v2 = vpop.f32.mrf.mxu1 }
 0x80f   :  { %v599_v6 = vmul.f32 1.442695, %v598_v1 }
 0x811   :  { %2852 = vpow2.f32 %v599_v6 }
 0x81e   :  { %v2853_v8 = vpop.eup %2852 }
 0x81f   :  { %v601_v10 = vadd.f32 1.0, %v2853_v8  ;;  %v766_v8 = vmul.f32 0.7509803, %v3172_v57  ;;  %v2364_v57 = vld [vmem:[%s3514_s0 + $0x6] ss:$0 sm:$0xff] }
 0x821   :  { %v603_v11 = vmul.f32 %v601_v10, %v601_v10  ;;  %v768_v10 = vld [vmem:[%s3515_s1 + $0x20] sm:$0x3] }
 0x823   :  { %v604_v12 = vadd.f32 1.0, %v603_v11 }
 0x825   :  { %2854 = vrcp.f32 %v604_v12 }
 0x832   :  { %v2855_v15 = vpop.eup %2854 }
 0x833   :  { %v606_v17 = vmul.f32 %v2855_v15, %v602_v14 }
 0x835   :  { %v607_v19 = vsub.f32 %v597_v62, %v606_v17 }
 0x837   :  { %v608_v20 = vpack.c.bf16 %v607_v19, %v607_v19 }
 0x839   :  { %2596 = vmatmul.mubr.msk.bf16.vlgmr.msra.gmra.mxu0 %vm156_vm4, %v608_v20 }
 0x83a   :  { %2608 = vmatpush3.bf16.msra.mxu0 %v3092_v0  ;;  %2611 = vmatprep.mubr.msk.bf16.mxu0 %vm2974_vm1, %v2973_v3 }
 0x83b   :  { %2609 = vmatprep.subr.bf16.mxu0 %v2973_v3 }
 0x83e   :  { %2610 = vmatpush3.bf16.msra.mxu0 %v3102_v4 }
 0x83f   :  { %2621 = vmatprep.subr.bf16.mxu0 %v2973_v3 }
 0x8f9   :  { %v646_v21 = vpop.f32.mrf.mxu0 }
 0x8fa   :  { %v647_v22 = vadd.f32 %v3078_v45, %v646_v21 }
 0x8fb   :  { %v2597_v23 = vpop.f32.mrf.mxu0 }
 0x8fc   :  { %v652_v24 = vmin.f32 %v647_v22, 20.0  ;;  %v656_v33 = vmul.f32 2.0, %v647_v22 }
 0x8fd   :  { %v649_v25 = vpop.f32.mrf.mxu0 }
 0x8fe   :  { %v653_v26 = vmul.f32 1.442695, %v652_v24 }
 0x8ff   :  { %v2598_v28 = vpop.f32.mrf.mxu0 }
 0x900   :  { %2856 = vpow2.f32 %v653_v26 }
 0x90d   :  { %v2857_v29 = vpop.eup %2856 }
 0x90e   :  { %v655_v30 = vadd.f32 1.0, %v2857_v29 }
 0x910   :  { %v657_v31 = vmul.f32 %v655_v30, %v655_v30 }
 0x912   :  { %v658_v32 = vadd.f32 1.0, %v657_v31 }
 0x914   :  { %2858 = vrcp.f32 %v658_v32 }
 0x921   :  { %v2859_v34 = vpop.eup %2858 }
 0x922   :  { %v660_v35 = vmul.f32 %v2859_v34, %v656_v33 }
 0x924   :  { %v661_v36 = vsub.f32 %v647_v22, %v660_v35 }
 0x926   :  { %v662_v37 = vpack.c.bf16 %v661_v36, %v661_v36 }
 0x928   :  { %2604 = vmatmul.mubr.msk.bf16.vlgmr.msra.gmra.mxu1 %vm156_vm4, %v662_v37 }
 0x929   :  { %2616 = vmatpush3.bf16.msra.mxu1 %v3014_v9  ;;  %2617 = vmatprep.mubr.msk.bf16.mxu1 %vm2974_vm1, %v2973_v3 }
 0x92a   :  { %2629 = vmatprep.subr.bf16.mxu1 %v2973_v3 }
 0x9e8   :  { %v700_v38 = vpop.f32.mrf.mxu1 }
 0x9e9   :  { %v701_v39 = vadd.f32 %v3109_v5, %v700_v38 }
 0x9ea   :  { %v2605_v40 = vpop.f32.mrf.mxu1 }
 0x9eb   :  { %v706_v43 = vmin.f32 %v701_v39, 20.0  ;;  %v710_v52 = vmul.f32 2.0, %v701_v39 }
 0x9ec   :  { %v703_v7 = vpop.f32.mrf.mxu1 }
 0x9ed   :  { %v707_v46 = vmul.f32 1.442695, %v706_v43 }
 0x9ee   :  { %v2606_v47 = vpop.f32.mrf.mxu1 }
 0x9ef   :  { %2860 = vpow2.f32 %v707_v46 }
 0x9fc   :  { %v2861_v48 = vpop.eup %2860 }
 0x9fd   :  { %v709_v49 = vadd.f32 1.0, %v2861_v48 }
 0x9ff   :  { %v711_v50 = vmul.f32 %v709_v49, %v709_v49 }
 0xa01   :  { %v712_v51 = vadd.f32 1.0, %v711_v50 }
 0xa03   :  { %2862 = vrcp.f32 %v712_v51 }
 0xa10   :  { %v2863_v53 = vpop.eup %2862 }
 0xa11   :  { %v714_v54 = vmul.f32 %v2863_v53, %v710_v52 }
 0xa13   :  { %v715_v55 = vsub.f32 %v701_v39, %v714_v54 }
 0xa15   :  { %v716_v56 = vpack.c.bf16 %v715_v55, %v715_v55 }
 0xa17   :  { %2612 = vmatmul.mubr.msk.bf16.vlgmr.msra.gmra.mxu0 %vm156_vm4, %v716_v56 }
 0xa18   :  { %2622 = vmatpush3.bf16.msra.mxu0 %v3032_v13  ;;  %2625 = vmatprep.mubr.msk.bf16.mxu0 %vm2974_vm1, %v2973_v3 }
 0xa19   :  { %2623 = vmatprep.subr.bf16.mxu0 %v2973_v3 }
 0xa1c   :  { %2624 = vmatpush3.bf16.msra.mxu0 %v3042_v16 }
 0xa1d   :  { %2637 = vmatprep.subr.bf16.mxu0 %v2973_v3 }
 0xad7   :  { %v754_v58 = vpop.f32.mrf.mxu0 }
 0xad8   :  { %v755_v42 = vadd.f32 %v3122_v27, %v754_v58 }
 0xad9   :  { %v2613_v59 = vpop.f32.mrf.mxu0 }
 0xada   :  { %v761_v61 = vmul.f32 0.25513408, %v755_v42 }
 0xadb   :  { %v757_v62 = vpop.f32.mrf.mxu0 }
 0xadc   :  { %v762_v63 = vsub.f32 %v760_v60, %v761_v61 }
 0xadd   :  { %v2614_v1 = vpop.f32.mrf.mxu0 }
 0xade   :  { %v2363_v2 = vclamps-f32 %v762_v63, 1.0 }
 0xae0   :  { %v765_v6 = vmul.f32 0.24892682, %v2363_v2 }
 0xae2   :  { %v767_v11 = vadd.f32 %v766_v8, %v765_v6 }
 0xae4   :  { %v3214_v12 = vadd.f32 %v768_v10, %v767_v11 }
 0xae6   :  { %v771_v14 = vpack.c.bf16 %v3214_v12, %v3214_v12 }
 0xae8   :  { %2618 = vmatmul.mubr.msk.bf16.vlgmr.msra.gmra.mxu1 %vm92_vm3, %v771_v14 }
 0xae9   :  { %2630 = vmatpush3.bf16.msra.mxu1 %v3061_v41  ;;  %2633 = vmatprep.mubr.msk.bf16.mxu1 %vm2974_vm1, %v2973_v3 }
 0xaea   :  { %2631 = vmatprep.subr.bf16.mxu1 %v2973_v3 }
 0xaed   :  { %2632 = vmatpush3.bf16.msra.mxu1 %v3071_v44 }
 0xaee   :  { %2645 = vmatprep.subr.bf16.mxu1 %v2973_v3 }
 0xba8   :  { %v813_v15 = vpop.f32.mrf.mxu1 }
 0xba9   :  { %v814_v17 = vadd.f32 %v2364_v57, %v813_v15 }
 0xbaa   :  { %v2619_v19 = vpop.f32.mrf.mxu1 }
 0xbab   :  { %v819_v20 = vadd.f32 %v814_v17, %v3049_v18  ;;  %v982_v17 = vmul.f32 1.0239637, %v3214_v12 }
 0xbac   :  { %v816_v21 = vpop.f32.mrf.mxu1 }
 0xbad   :  { %v820_v22 = vmin.f32 %v819_v20, 20.0  ;;  %v824_v30 = vmul.f32 2.0, %v819_v20 }
 0xbae   :  { %v2620_v23 = vpop.f32.mrf.mxu1 }
 0xbaf   :  { %v821_v24 = vmul.f32 1.442695, %v820_v22 }
 0xbb1   :  { %2864 = vpow2.f32 %v821_v24 }
 0xbbe   :  { %v2865_v25 = vpop.eup %2864 }
 0xbbf   :  { %v823_v26 = vadd.f32 1.0, %v2865_v25  ;;  %v988_v25 = vmul.f32 0.71584207, %v3214_v12  ;;  %v2370_v12 = vld [vmem:[%s3514_s0 + $0x5] ss:$0 sm:$0xff] }
 0xbc1   :  { %v825_v28 = vmul.f32 %v823_v26, %v823_v26  ;;  %v990_v26 = vld [vmem:[%s3515_s1 + $0x28] sm:$0x3] }
 0xbc3   :  { %v826_v29 = vadd.f32 1.0, %v825_v28 }
 0xbc5   :  { %2866 = vrcp.f32 %v826_v29 }
 0xbd2   :  { %v2867_v31 = vpop.eup %2866 }
 0xbd3   :  { %v828_v32 = vmul.f32 %v2867_v31, %v824_v30 }
 0xbd5   :  { %v829_v33 = vsub.f32 %v819_v20, %v828_v32 }
 0xbd7   :  { %v830_v34 = vpack.c.bf16 %v829_v33, %v829_v33 }
 0xbd9   :  { %2626 = vmatmul.mubr.msk.bf16.vlgmr.msra.gmra.mxu0 %vm156_vm4, %v830_v34 }
 0xbda   :  { %2638 = vmatpush3.bf16.msra.mxu0 %v3092_v0  ;;  %2641 = vmatprep.mubr.msk.bf16.mxu0 %vm2974_vm1, %v2973_v3 }
 0xbdb   :  { %2639 = vmatprep.subr.bf16.mxu0 %v2973_v3 }
 0xbde   :  { %2640 = vmatpush3.bf16.msra.mxu0 %v3102_v4 }
 0xbdf   :  { %2651 = vmatprep.subr.bf16.mxu0 %v2973_v3 }
 0xc99   :  { %v868_v35 = vpop.f32.mrf.mxu0 }
 0xc9a   :  { %v869_v36 = vadd.f32 %v3078_v45, %v868_v35 }
 0xc9b   :  { %v2627_v37 = vpop.f32.mrf.mxu0 }
 0xc9c   :  { %v874_v38 = vmin.f32 %v869_v36, 20.0  ;;  %v878_v49 = vmul.f32 2.0, %v869_v36 }
 0xc9d   :  { %v871_v39 = vpop.f32.mrf.mxu0 }
 0xc9e   :  { %v875_v40 = vmul.f32 1.442695, %v874_v38 }
 0xc9f   :  { %v2628_v43 = vpop.f32.mrf.mxu0 }
 0xca0   :  { %2868 = vpow2.f32 %v875_v40 }
 0xcad   :  { %v2869_v7 = vpop.eup %2868 }
 0xcae   :  { %v877_v46 = vadd.f32 1.0, %v2869_v7 }
 0xcb0   :  { %v879_v47 = vmul.f32 %v877_v46, %v877_v46 }
 0xcb2   :  { %v880_v48 = vadd.f32 1.0, %v879_v47 }
 0xcb4   :  { %2870 = vrcp.f32 %v880_v48 }
 0xcc1   :  { %v2871_v50 = vpop.eup %2870 }
 0xcc2   :  { %v882_v51 = vmul.f32 %v2871_v50, %v878_v49 }
 0xcc4   :  { %v883_v52 = vsub.f32 %v869_v36, %v882_v51 }
 0xcc6   :  { %v884_v53 = vpack.c.bf16 %v883_v52, %v883_v52 }
 0xcc8   :  { %2634 = vmatmul.mubr.msk.bf16.vlgmr.msra.gmra.mxu1 %vm156_vm4, %v884_v53 }
 0xcc9   :  { %2646 = vmatpush3.bf16.msra.mxu1 %v3014_v9  ;;  %2647 = vmatprep.mubr.msk.bf16.mxu1 %vm2974_vm1, %v2973_v3 }
 0xcca   :  { %2659 = vmatprep.subr.bf16.mxu1 %v2973_v3 }
 0xd88   :  { %v922_v54 = vpop.f32.mrf.mxu1 }
 0xd89   :  { %v923_v55 = vadd.f32 %v3109_v5, %v922_v54 }
 0xd8a   :  { %v2635_v56 = vpop.f32.mrf.mxu1 }
 0xd8b   :  { %v928_v58 = vmin.f32 %v923_v55, 20.0  ;;  %v932_v2 = vmul.f32 2.0, %v923_v55 }
 0xd8c   :  { %v925_v42 = vpop.f32.mrf.mxu1 }
 0xd8d   :  { %v929_v59 = vmul.f32 1.442695, %v928_v58 }
 0xd8e   :  { %v2636_v60 = vpop.f32.mrf.mxu1 }
 0xd8f   :  { %2872 = vpow2.f32 %v929_v59 }
 0xd9c   :  { %v2873_v61 = vpop.eup %2872 }
 0xd9d   :  { %v931_v62 = vadd.f32 1.0, %v2873_v61 }
 0xd9f   :  { %v933_v63 = vmul.f32 %v931_v62, %v931_v62 }
 0xda1   :  { %v934_v1 = vadd.f32 1.0, %v933_v63 }
 0xda3   :  { %2874 = vrcp.f32 %v934_v1 }
 0xdb0   :  { %v2875_v6 = vpop.eup %2874 }
 0xdb1   :  { %v936_v8 = vmul.f32 %v2875_v6, %v932_v2 }
 0xdb3   :  { %v937_v10 = vsub.f32 %v923_v55, %v936_v8 }
 0xdb5   :  { %v938_v11 = vpack.c.bf16 %v937_v10, %v937_v10 }
 0xdb7   :  { %2642 = vmatmul.mubr.msk.bf16.vlgmr.msra.gmra.mxu0 %vm156_vm4, %v938_v11 }
 0xdb8   :  { %2652 = vmatpush3.bf16.msra.mxu0 %v3032_v13  ;;  %2655 = vmatprep.mubr.msk.bf16.mxu0 %vm2974_vm1, %v2973_v3 }
 0xdb9   :  { %2653 = vmatprep.subr.bf16.mxu0 %v2973_v3 }
 0xdbc   :  { %2654 = vmatpush3.bf16.msra.mxu0 %v3042_v16 }
 0xdbd   :  { %2667 = vmatprep.subr.bf16.mxu0 %v2973_v3 }
 0xe77   :  { %v976_v14 = vpop.f32.mrf.mxu0 }
 0xe78   :  { %v977_v57 = vadd.f32 %v3122_v27, %v976_v14 }
 0xe79   :  { %v2643_v15 = vpop.f32.mrf.mxu0 }
 0xe7a   :  { %v983_v19 = vmul.f32 0.22023082, %v977_v57 }
 0xe7b   :  { %v979_v20 = vpop.f32.mrf.mxu0 }
 0xe7c   :  { %v984_v21 = vsub.f32 %v982_v17, %v983_v19 }
 0xe7d   :  { %v2644_v22 = vpop.f32.mrf.mxu0 }
 0xe7e   :  { %v2369_v23 = vclamps-f32 %v984_v21, 1.0 }
 0xe80   :  { %v987_v24 = vmul.f32 0.2841015, %v2369_v23 }
 0xe82   :  { %v989_v28 = vadd.f32 %v988_v25, %v987_v24 }
 0xe84   :  { %v3256_v29 = vadd.f32 %v990_v26, %v989_v28 }
 0xe86   :  { %v993_v30 = vpack.c.bf16 %v3256_v29, %v3256_v29 }
 0xe88   :  { %2648 = vmatmul.mubr.msk.bf16.vlgmr.msra.gmra.mxu1 %vm92_vm3, %v993_v30 }
 0xe89   :  { %2660 = vmatpush3.bf16.msra.mxu1 %v3061_v41  ;;  %2663 = vmatprep.mubr.msk.bf16.mxu1 %vm2974_vm1, %v2973_v3 }
 0xe8a   :  { %2661 = vmatprep.subr.bf16.mxu1 %v2973_v3 }
 0xe8d   :  { %2662 = vmatpush3.bf16.msra.mxu1 %v3071_v44 }
 0xe8e   :  { %2675 = vmatprep.subr.bf16.mxu1 %v2973_v3 }
 0xf48   :  { %v1035_v31 = vpop.f32.mrf.mxu1 }
 0xf49   :  { %v1036_v32 = vadd.f32 %v2370_v12, %v1035_v31 }
 0xf4a   :  { %v2649_v33 = vpop.f32.mrf.mxu1 }
 0xf4b   :  { %v1041_v34 = vadd.f32 %v1036_v32, %v3049_v18  ;;  %v1204_v32 = vmul.f32 1.0170971, %v3256_v29 }
 0xf4c   :  { %v1038_v35 = vpop.f32.mrf.mxu1 }
 0xf4d   :  { %v1042_v36 = vmin.f32 %v1041_v34, 20.0  ;;  %v1046_v46 = vmul.f32 2.0, %v1041_v34 }
 0xf4e   :  { %v2650_v37 = vpop.f32.mrf.mxu1 }
 0xf4f   :  { %v1043_v38 = vmul.f32 1.442695, %v1042_v36 }
 0xf51   :  { %2876 = vpow2.f32 %v1043_v38 }
 0xf5e   :  { %v2877_v39 = vpop.eup %2876 }
 0xf5f   :  { %v1045_v40 = vadd.f32 1.0, %v2877_v39  ;;  %v1210_v39 = vmul.f32 0.6691125, %v3256_v29  ;;  %v2376_v29 = vld [vmem:[%s3514_s0 + $0x4] ss:$0 sm:$0xff] }
 0xf61   :  { %v1047_v43 = vmul.f32 %v1045_v40, %v1045_v40  ;;  %v1212_v40 = vld [vmem:[%s3515_s1 + $0x30] sm:$0x3] }
 0xf63   :  { %v1048_v7 = vadd.f32 1.0, %v1047_v43 }
 0xf65   :  { %2878 = vrcp.f32 %v1048_v7 }
 0xf72   :  { %v2879_v47 = vpop.eup %2878 }
 0xf73   :  { %v1050_v48 = vmul.f32 %v2879_v47, %v1046_v46 }
 0xf75   :  { %v1051_v49 = vsub.f32 %v1041_v34, %v1050_v48 }
 0xf77   :  { %v1052_v50 = vpack.c.bf16 %v1051_v49, %v1051_v49 }
 0xf79   :  { %2656 = vmatmul.mubr.msk.bf16.vlgmr.msra.gmra.mxu0 %vm156_vm4, %v1052_v50 }
 0xf7a   :  { %2668 = vmatpush3.bf16.msra.mxu0 %v3092_v0  ;;  %2671 = vmatprep.mubr.msk.bf16.mxu0 %vm2974_vm1, %v2973_v3 }
 0xf7b   :  { %2669 = vmatprep.subr.bf16.mxu0 %v2973_v3 }
 0xf7e   :  { %2670 = vmatpush3.bf16.msra.mxu0 %v3102_v4 }
 0xf7f   :  { %2681 = vmatprep.subr.bf16.mxu0 %v2973_v3 }
0x1039   :  { %v1090_v51 = vpop.f32.mrf.mxu0 }
0x103a   :  { %v1091_v52 = vadd.f32 %v3078_v45, %v1090_v51 }
0x103b   :  { %v2657_v53 = vpop.f32.mrf.mxu0 }
0x103c   :  { %v1096_v54 = vmin.f32 %v1091_v52, 20.0  ;;  %v1100_v62 = vmul.f32 2.0, %v1091_v52 }
0x103d   :  { %v1093_v55 = vpop.f32.mrf.mxu0 }
0x103e   :  { %v1097_v56 = vmul.f32 1.442695, %v1096_v54 }
0x103f   :  { %v2658_v58 = vpop.f32.mrf.mxu0 }
0x1040   :  { %2880 = vpow2.f32 %v1097_v56 }
0x104d   :  { %v2881_v42 = vpop.eup %2880 }
0x104e   :  { %v1099_v59 = vadd.f32 1.0, %v2881_v42 }
0x1050   :  { %v1101_v60 = vmul.f32 %v1099_v59, %v1099_v59 }
0x1052   :  { %v1102_v61 = vadd.f32 1.0, %v1101_v60 }
0x1054   :  { %2882 = vrcp.f32 %v1102_v61 }
0x1061   :  { %v2883_v63 = vpop.eup %2882 }
0x1062   :  { %v1104_v1 = vmul.f32 %v2883_v63, %v1100_v62 }
0x1064   :  { %v1105_v2 = vsub.f32 %v1091_v52, %v1104_v1 }
0x1066   :  { %v1106_v6 = vpack.c.bf16 %v1105_v2, %v1105_v2 }
0x1068   :  { %2664 = vmatmul.mubr.msk.bf16.vlgmr.msra.gmra.mxu1 %vm156_vm4, %v1106_v6 }
0x1069   :  { %2676 = vmatpush3.bf16.msra.mxu1 %v3014_v9  ;;  %2677 = vmatprep.mubr.msk.bf16.mxu1 %vm2974_vm1, %v2973_v3 }
0x106a   :  { %2689 = vmatprep.subr.bf16.mxu1 %v2973_v3 }
0x1128   :  { %v1144_v8 = vpop.f32.mrf.mxu1 }
0x1129   :  { %v1145_v10 = vadd.f32 %v3109_v5, %v1144_v8 }
0x112a   :  { %v2665_v11 = vpop.f32.mrf.mxu1 }
0x112b   :  { %v1150_v14 = vmin.f32 %v1145_v10, 20.0  ;;  %v1154_v23 = vmul.f32 2.0, %v1145_v10 }
0x112c   :  { %v1147_v57 = vpop.f32.mrf.mxu1 }
0x112d   :  { %v1151_v15 = vmul.f32 1.442695, %v1150_v14 }
0x112e   :  { %v2666_v17 = vpop.f32.mrf.mxu1 }
0x112f   :  { %2884 = vpow2.f32 %v1151_v15 }
0x113c   :  { %v2885_v19 = vpop.eup %2884 }
0x113d   :  { %v1153_v20 = vadd.f32 1.0, %v2885_v19 }
0x113f   :  { %v1155_v21 = vmul.f32 %v1153_v20, %v1153_v20 }
0x1141   :  { %v1156_v22 = vadd.f32 1.0, %v1155_v21 }
0x1143   :  { %2886 = vrcp.f32 %v1156_v22 }
0x1150   :  { %v2887_v24 = vpop.eup %2886 }
0x1151   :  { %v1158_v25 = vmul.f32 %v2887_v24, %v1154_v23 }
0x1153   :  { %v1159_v26 = vsub.f32 %v1145_v10, %v1158_v25 }
0x1155   :  { %v1160_v28 = vpack.c.bf16 %v1159_v26, %v1159_v26 }
0x1157   :  { %2672 = vmatmul.mubr.msk.bf16.vlgmr.msra.gmra.mxu0 %vm156_vm4, %v1160_v28 }
0x1158   :  { %2682 = vmatpush3.bf16.msra.mxu0 %v3032_v13  ;;  %2685 = vmatprep.mubr.msk.bf16.mxu0 %vm2974_vm1, %v2973_v3 }
0x1159   :  { %2683 = vmatprep.subr.bf16.mxu0 %v2973_v3 }
0x115c   :  { %2684 = vmatpush3.bf16.msra.mxu0 %v3042_v16 }
0x115d   :  { %2697 = vmatprep.subr.bf16.mxu0 %v2973_v3 }
0x1217   :  { %v1198_v30 = vpop.f32.mrf.mxu0 }
0x1218   :  { %v1199_v12 = vadd.f32 %v3122_v27, %v1198_v30 }
0x1219   :  { %v2673_v31 = vpop.f32.mrf.mxu0 }
0x121a   :  { %v1205_v33 = vmul.f32 0.18570583, %v1199_v12 }
0x121b   :  { %v1201_v34 = vpop.f32.mrf.mxu0 }
0x121c   :  { %v1206_v35 = vsub.f32 %v1204_v32, %v1205_v33 }
0x121d   :  { %v2674_v36 = vpop.f32.mrf.mxu0 }
0x121e   :  { %v2375_v37 = vclamps-f32 %v1206_v35, 1.0 }
0x1220   :  { %v1209_v38 = vmul.f32 0.33085543, %v2375_v37 }
0x1222   :  { %v1211_v43 = vadd.f32 %v1210_v39, %v1209_v38 }
0x1224   :  { %v3298_v7 = vadd.f32 %v1212_v40, %v1211_v43 }
0x1226   :  { %v1215_v46 = vpack.c.bf16 %v3298_v7, %v3298_v7 }
0x1228   :  { %2678 = vmatmul.mubr.msk.bf16.vlgmr.msra.gmra.mxu1 %vm92_vm3, %v1215_v46 }
0x1229   :  { %2690 = vmatpush3.bf16.msra.mxu1 %v3061_v41  ;;  %2693 = vmatprep.mubr.msk.bf16.mxu1 %vm2974_vm1, %v2973_v3 }
0x122a   :  { %2691 = vmatprep.subr.bf16.mxu1 %v2973_v3 }
0x122d   :  { %2692 = vmatpush3.bf16.msra.mxu1 %v3071_v44 }
0x122e   :  { %2705 = vmatprep.subr.bf16.mxu1 %v2973_v3 }
0x12e8   :  { %v1257_v47 = vpop.f32.mrf.mxu1 }
0x12e9   :  { %v1258_v48 = vadd.f32 %v2376_v29, %v1257_v47  ;;  %v1426_v29 = vmul.f32 1.0114081, %v3298_v7 }
0x12ea   :  { %v2679_v49 = vpop.f32.mrf.mxu1 }
0x12eb   :  { %v1263_v50 = vadd.f32 %v1258_v48, %v3049_v18 }
0x12ec   :  { %v1260_v51 = vpop.f32.mrf.mxu1 }
0x12ed   :  { %v1264_v52 = vmin.f32 %v1263_v50, 20.0  ;;  %v1268_v59 = vmul.f32 2.0, %v1263_v50 }
0x12ee   :  { %v2680_v53 = vpop.f32.mrf.mxu1 }
0x12ef   :  { %v1265_v54 = vmul.f32 1.442695, %v1264_v52  ;;  %v1432_v53 = vmul.f32 0.6039645, %v3298_v7  ;;  %v2382_v7 = vld [vmem:[%s3514_s0 + $0x3] ss:$0 sm:$0xff] }
0x12f1   :  { %2888 = vpow2.f32 %v1265_v54  ;;  %v1434_v54 = vld [vmem:[%s3515_s1 + $0x38] sm:$0x3] }
0x12fe   :  { %v2889_v55 = vpop.eup %2888 }
0x12ff   :  { %v1267_v56 = vadd.f32 1.0, %v2889_v55 }
0x1301   :  { %v1269_v58 = vmul.f32 %v1267_v56, %v1267_v56 }
0x1303   :  { %v1270_v42 = vadd.f32 1.0, %v1269_v58 }
0x1305   :  { %2890 = vrcp.f32 %v1270_v42 }
0x1312   :  { %v2891_v60 = vpop.eup %2890 }
0x1313   :  { %v1272_v61 = vmul.f32 %v2891_v60, %v1268_v59 }
0x1315   :  { %v1273_v62 = vsub.f32 %v1263_v50, %v1272_v61 }
0x1317   :  { %v1274_v63 = vpack.c.bf16 %v1273_v62, %v1273_v62 }
0x1319   :  { %2686 = vmatmul.mubr.msk.bf16.vlgmr.msra.gmra.mxu0 %vm156_vm4, %v1274_v63 }
0x131a   :  { %2698 = vmatpush3.bf16.msra.mxu0 %v3092_v0  ;;  %2701 = vmatprep.mubr.msk.bf16.mxu0 %vm2974_vm1, %v2973_v3 }
0x131b   :  { %2699 = vmatprep.subr.bf16.mxu0 %v2973_v3 }
0x131e   :  { %2700 = vmatpush3.bf16.msra.mxu0 %v3102_v4 }
0x131f   :  { %2711 = vmatprep.subr.bf16.mxu0 %v2973_v3 }
0x13d9   :  { %v1312_v1 = vpop.f32.mrf.mxu0 }
0x13da   :  { %v1313_v2 = vadd.f32 %v3078_v45, %v1312_v1 }
0x13db   :  { %v2687_v6 = vpop.f32.mrf.mxu0 }
0x13dc   :  { %v1318_v8 = vmin.f32 %v1313_v2, 20.0  ;;  %v1322_v20 = vmul.f32 2.0, %v1313_v2 }
0x13dd   :  { %v1315_v10 = vpop.f32.mrf.mxu0 }
0x13de   :  { %v1319_v11 = vmul.f32 1.442695, %v1318_v8 }
0x13df   :  { %v2688_v14 = vpop.f32.mrf.mxu0 }
0x13e0   :  { %2892 = vpow2.f32 %v1319_v11 }
0x13ed   :  { %v2893_v57 = vpop.eup %2892 }
0x13ee   :  { %v1321_v15 = vadd.f32 1.0, %v2893_v57 }
0x13f0   :  { %v1323_v17 = vmul.f32 %v1321_v15, %v1321_v15 }
0x13f2   :  { %v1324_v19 = vadd.f32 1.0, %v1323_v17 }
0x13f4   :  { %2894 = vrcp.f32 %v1324_v19 }
0x1401   :  { %v2895_v21 = vpop.eup %2894 }
0x1402   :  { %v1326_v22 = vmul.f32 %v2895_v21, %v1322_v20  ;;  %v3365_v20 = vld [vmem:[%s3514_s0 + $0x48] ss:$0 sm:$0xff] }
0x1404   :  { %v1327_v23 = vsub.f32 %v1313_v2, %v1326_v22 }
0x1406   :  { %v1328_v24 = vpack.c.bf16 %v1327_v23, %v1327_v23 }
0x1408   :  { %2694 = vmatmul.mubr.msk.bf16.vlgmr.msra.gmra.mxu1 %vm156_vm4, %v1328_v24 }
0x1409   :  { %2706 = vmatpush3.bf16.msra.mxu1 %v3014_v9  ;;  %2707 = vmatprep.mubr.msk.bf16.mxu1 %vm2974_vm1, %v2973_v3 }
0x140a   :  { %2719 = vmatprep.subr.bf16.mxu1 %v2973_v3 }
0x14c8   :  { %v1366_v45 = vpop.f32.mrf.mxu1 }
0x14c9   :  { %v1367_v25 = vadd.f32 %v3109_v5, %v1366_v45 }
0x14ca   :  { %v2695_v26 = vpop.f32.mrf.mxu1 }
0x14cb   :  { %v1372_v28 = vmin.f32 %v1367_v25, 20.0  ;;  %v1376_v36 = vmul.f32 2.0, %v1367_v25 }
0x14cc   :  { %v1369_v30 = vpop.f32.mrf.mxu1 }
0x14cd   :  { %v1373_v12 = vmul.f32 1.442695, %v1372_v28 }
0x14ce   :  { %v2696_v31 = vpop.f32.mrf.mxu1 }
0x14cf   :  { %2896 = vpow2.f32 %v1373_v12 }
0x14dc   :  { %v2897_v32 = vpop.eup %2896 }
0x14dd   :  { %v1375_v33 = vadd.f32 1.0, %v2897_v32 }
0x14df   :  { %v1377_v34 = vmul.f32 %v1375_v33, %v1375_v33 }
0x14e1   :  { %v1378_v35 = vadd.f32 1.0, %v1377_v34 }
0x14e3   :  { %2898 = vrcp.f32 %v1378_v35 }
0x14f0   :  { %v2899_v37 = vpop.eup %2898 }
0x14f1   :  { %v1380_v38 = vmul.f32 %v2899_v37, %v1376_v36  ;;  %v3376_v37 = vld [vmem:[%s3514_s0 + $0x70] ss:$0 sm:$0xff] }
0x14f3   :  { %v1381_v39 = vsub.f32 %v1367_v25, %v1380_v38 }
0x14f5   :  { %v1382_v40 = vpack.c.bf16 %v1381_v39, %v1381_v39 }
0x14f7   :  { %2702 = vmatmul.mubr.msk.bf16.vlgmr.msra.gmra.mxu0 %vm156_vm4, %v1382_v40 }
0x14f8   :  { %2712 = vmatpush3.bf16.msra.mxu0 %v3032_v13  ;;  %2715 = vmatprep.mubr.msk.bf16.mxu0 %vm2974_vm1, %v2973_v3 }
0x14f9   :  { %2713 = vmatprep.subr.bf16.mxu0 %v2973_v3 }
0x14fc   :  { %2714 = vmatpush3.bf16.msra.mxu0 %v3042_v16 }
0x14fd   :  { %2727 = vmatprep.subr.bf16.mxu0 %v2973_v3 }
0x15b7   :  { %v1420_v5 = vpop.f32.mrf.mxu0 }
0x15b8   :  { %v1421_v43 = vadd.f32 %v3122_v27, %v1420_v5 }
0x15b9   :  { %v2703_v46 = vpop.f32.mrf.mxu0 }
0x15ba   :  { %v1427_v47 = vmul.f32 0.15148056, %v1421_v43 }
0x15bb   :  { %v1423_v48 = vpop.f32.mrf.mxu0 }
0x15bc   :  { %v1428_v49 = vsub.f32 %v1426_v29, %v1427_v47 }
0x15bd   :  { %v2704_v50 = vpop.f32.mrf.mxu0 }
0x15be   :  { %v2381_v51 = vclamps-f32 %v1428_v49, 1.0 }
0x15c0   :  { %v1431_v52 = vmul.f32 0.39601925, %v2381_v51 }
0x15c2   :  { %v1433_v55 = vadd.f32 %v1432_v53, %v1431_v52 }
0x15c4   :  { %v3340_v56 = vadd.f32 %v1434_v54, %v1433_v55 }
0x15c6   :  { %v1437_v27 = vpack.c.bf16 %v3340_v56, %v3340_v56 }
0x15c8   :  { %2708 = vmatmul.mubr.msk.bf16.vlgmr.msra.gmra.mxu1 %vm92_vm3, %v1437_v27  ;;  %v3389_v27 = vld [vmem:[%s3514_s0 + $0x98] ss:$0 sm:$0xff] }
0x15c9   :  { %2720 = vmatpush3.bf16.msra.mxu1 %v3061_v41  ;;  %2723 = vmatprep.mubr.msk.bf16.mxu1 %vm2974_vm1, %v2973_v3 }
0x15ca   :  { %2721 = vmatprep.subr.bf16.mxu1 %v2973_v3 }
0x15cd   :  { %2722 = vmatpush3.bf16.msra.mxu1 %v3071_v44 }
0x15ce   :  { %2735 = vmatprep.subr.bf16.mxu1 %v2973_v3 }
0x1688   :  { %v1479_v58 = vpop.f32.mrf.mxu1 }
0x1689   :  { %v1480_v42 = vadd.f32 %v2382_v7, %v1479_v58 }
0x168a   :  { %v2709_v59 = vpop.f32.mrf.mxu1 }
0x168b   :  { %v1485_v60 = vadd.f32 %v1480_v42, %v3049_v18  ;;  %v1648_v42 = vmul.f32 1.0068747, %v3340_v56 }
0x168c   :  { %v1482_v61 = vpop.f32.mrf.mxu1 }
0x168d   :  { %v1486_v62 = vmin.f32 %v1485_v60, 20.0  ;;  %v1490_v11 = vmul.f32 2.0, %v1485_v60 }
0x168e   :  { %v2710_v63 = vpop.f32.mrf.mxu1 }
0x168f   :  { %v1487_v1 = vmul.f32 1.442695, %v1486_v62 }
0x1691   :  { %2900 = vpow2.f32 %v1487_v1 }
0x169e   :  { %v2901_v2 = vpop.eup %2900 }
0x169f   :  { %v1489_v6 = vadd.f32 1.0, %v2901_v2  ;;  %v1654_v2 = vmul.f32 0.50693476, %v3340_v56  ;;  %v2388_v56 = vld [vmem:[%s3514_s0 + $0x2] ss:$0 sm:$0xff] }
0x16a1   :  { %v1491_v8 = vmul.f32 %v1489_v6, %v1489_v6  ;;  %v1656_v6 = vld [vmem:[%s3515_s1 + $0x40] sm:$0x3] }
0x16a3   :  { %v1492_v10 = vadd.f32 1.0, %v1491_v8 }
0x16a5   :  { %2902 = vrcp.f32 %v1492_v10 }
0x16b2   :  { %v2903_v14 = vpop.eup %2902 }
0x16b3   :  { %v1494_v57 = vmul.f32 %v2903_v14, %v1490_v11 }
0x16b5   :  { %v1495_v15 = vsub.f32 %v1485_v60, %v1494_v57 }
0x16b7   :  { %v1496_v17 = vpack.c.bf16 %v1495_v15, %v1495_v15 }
0x16b9   :  { %2716 = vmatmul.mubr.msk.bf16.vlgmr.msra.gmra.mxu0 %vm156_vm4, %v1496_v17 }
0x16ba   :  { %2728 = vmatpush3.bf16.msra.mxu0 %v3092_v0  ;;  %2731 = vmatprep.mubr.msk.bf16.mxu0 %vm2974_vm1, %v2973_v3 }
0x16bb   :  { %2729 = vmatprep.subr.bf16.mxu0 %v2973_v3 }
0x16be   :  { %2730 = vmatpush3.bf16.msra.mxu0 %v3102_v4 }
0x16bf   :  { %2741 = vmatprep.subr.bf16.mxu0 %v2973_v3 }
0x1779   :  { %v1534_v19 = vpop.f32.mrf.mxu0 }
0x177a   :  { %v1535_v21 = vadd.f32 %v3365_v20, %v1534_v19 }
0x177b   :  { %v2717_v22 = vpop.f32.mrf.mxu0 }
0x177c   :  { %v1540_v23 = vmin.f32 %v1535_v21, 20.0  ;;  %v1544_v31 = vmul.f32 2.0, %v1535_v21 }
0x177d   :  { %v1537_v24 = vpop.f32.mrf.mxu0 }
0x177e   :  { %v1541_v45 = vmul.f32 1.442695, %v1540_v23 }
0x177f   :  { %v2718_v25 = vpop.f32.mrf.mxu0 }
0x1780   :  { %2904 = vpow2.f32 %v1541_v45 }
0x178d   :  { %v2905_v26 = vpop.eup %2904 }
0x178e   :  { %v1543_v28 = vadd.f32 1.0, %v2905_v26 }
0x1790   :  { %v1545_v30 = vmul.f32 %v1543_v28, %v1543_v28 }
0x1792   :  { %v1546_v12 = vadd.f32 1.0, %v1545_v30 }
0x1794   :  { %2906 = vrcp.f32 %v1546_v12 }
0x17a1   :  { %v2907_v32 = vpop.eup %2906 }
0x17a2   :  { %v1548_v33 = vmul.f32 %v2907_v32, %v1544_v31 }
0x17a4   :  { %v1549_v34 = vsub.f32 %v1535_v21, %v1548_v33 }
0x17a6   :  { %v1550_v35 = vpack.c.bf16 %v1549_v34, %v1549_v34 }
0x17a8   :  { %2724 = vmatmul.mubr.msk.bf16.vlgmr.msra.gmra.mxu1 %vm156_vm4, %v1550_v35 }
0x17a9   :  { %2736 = vmatpush3.bf16.msra.mxu1 %v3014_v9  ;;  %2737 = vmatprep.mubr.msk.bf16.mxu1 %vm2974_vm1, %v2973_v3 }
0x17aa   :  { %2749 = vmatprep.subr.bf16.mxu1 %v2973_v3 }
0x1868   :  { %v1588_v36 = vpop.f32.mrf.mxu1 }
0x1869   :  { %v1589_v38 = vadd.f32 %v3376_v37, %v1588_v36 }
0x186a   :  { %v2725_v39 = vpop.f32.mrf.mxu1 }
0x186b   :  { %v1594_v40 = vmin.f32 %v1589_v38, 20.0  ;;  %v1598_v50 = vmul.f32 2.0, %v1589_v38 }
0x186c   :  { %v1591_v5 = vpop.f32.mrf.mxu1 }
0x186d   :  { %v1595_v43 = vmul.f32 1.442695, %v1594_v40 }
0x186e   :  { %v2726_v46 = vpop.f32.mrf.mxu1 }
0x186f   :  { %2908 = vpow2.f32 %v1595_v43 }
0x187c   :  { %v2909_v29 = vpop.eup %2908 }
0x187d   :  { %v1597_v47 = vadd.f32 1.0, %v2909_v29 }
0x187f   :  { %v1599_v48 = vmul.f32 %v1597_v47, %v1597_v47 }
0x1881   :  { %v1600_v49 = vadd.f32 1.0, %v1599_v48 }
0x1883   :  { %2910 = vrcp.f32 %v1600_v49 }
0x1890   :  { %v2911_v51 = vpop.eup %2910 }
0x1891   :  { %v1602_v52 = vmul.f32 %v2911_v51, %v1598_v50 }
0x1893   :  { %v1603_v53 = vsub.f32 %v1589_v38, %v1602_v52 }
0x1895   :  { %v1604_v54 = vpack.c.bf16 %v1603_v53, %v1603_v53 }
0x1897   :  { %2732 = vmatmul.mubr.msk.bf16.vlgmr.msra.gmra.mxu0 %vm156_vm4, %v1604_v54 }
0x1898   :  { %2742 = vmatpush3.bf16.msra.mxu0 %v3032_v13  ;;  %2745 = vmatprep.mubr.msk.bf16.mxu0 %vm2974_vm1, %v2973_v3 }
0x1899   :  { %2743 = vmatprep.subr.bf16.mxu0 %v2973_v3 }
0x189c   :  { %2744 = vmatpush3.bf16.msra.mxu0 %v3042_v16 }
0x189d   :  { %2757 = vmatprep.subr.bf16.mxu0 %v2973_v3 }
0x1957   :  { %v1642_v55 = vpop.f32.mrf.mxu0 }
0x1958   :  { %v1643_v7 = vadd.f32 %v3389_v27, %v1642_v55 }
0x1959   :  { %v2733_v58 = vpop.f32.mrf.mxu0 }
0x195a   :  { %v1649_v59 = vmul.f32 0.1174593, %v1643_v7 }
0x195b   :  { %v1645_v60 = vpop.f32.mrf.mxu0 }
0x195c   :  { %v1650_v61 = vsub.f32 %v1648_v42, %v1649_v59 }
0x195d   :  { %v2734_v62 = vpop.f32.mrf.mxu0 }
0x195e   :  { %v2387_v63 = vclamps-f32 %v1650_v61, 1.0 }
0x1960   :  { %v1653_v1 = vmul.f32 0.49305764, %v2387_v63 }
0x1962   :  { %v1655_v8 = vadd.f32 %v1654_v2, %v1653_v1 }
0x1964   :  { %v3397_v10 = vadd.f32 %v1656_v6, %v1655_v8 }
0x1966   :  { %v1659_v11 = vpack.c.bf16 %v3397_v10, %v3397_v10 }
0x1968   :  { %2738 = vmatmul.mubr.msk.bf16.vlgmr.msra.gmra.mxu1 %vm92_vm3, %v1659_v11 }
0x1969   :  { %2750 = vmatpush3.bf16.msra.mxu1 %v3061_v41  ;;  %2753 = vmatprep.mubr.msk.bf16.mxu1 %vm2974_vm1, %v2973_v3 }
0x196a   :  { %2751 = vmatprep.subr.bf16.mxu1 %v2973_v3 }
0x196d   :  { %2752 = vmatpush3.bf16.msra.mxu1 %v3071_v44 }
0x196e   :  { %2765 = vmatprep.subr.bf16.mxu1 %v2973_v3 }
0x1a28   :  { %v1701_v14 = vpop.f32.mrf.mxu1 }
0x1a29   :  { %v1702_v57 = vadd.f32 %v2388_v56, %v1701_v14 }
0x1a2a   :  { %v2739_v15 = vpop.f32.mrf.mxu1 }
0x1a2b   :  { %v1707_v17 = vadd.f32 %v1702_v57, %v3049_v18  ;;  %v1870_v57 = vmul.f32 1.0034791, %v3397_v10 }
0x1a2c   :  { %v1704_v19 = vpop.f32.mrf.mxu1 }
0x1a2d   :  { %v1708_v21 = vmin.f32 %v1707_v17, 20.0  ;;  %v1712_v28 = vmul.f32 2.0, %v1707_v17 }
0x1a2e   :  { %v2740_v22 = vpop.f32.mrf.mxu1 }
0x1a2f   :  { %v1709_v23 = vmul.f32 1.442695, %v1708_v21 }
0x1a31   :  { %2912 = vpow2.f32 %v1709_v23 }
0x1a3e   :  { %v2913_v24 = vpop.eup %2912 }
0x1a3f   :  { %v1711_v45 = vadd.f32 1.0, %v2913_v24  ;;  %v1876_v24 = vmul.f32 0.3474959, %v3397_v10  ;;  %v2394_v10 = vld [vmem:[%s3514_s0 + $0x1] ss:$0 sm:$0xff] }
0x1a41   :  { %v1713_v25 = vmul.f32 %v1711_v45, %v1711_v45  ;;  %v1878_v45 = vld [vmem:[%s3515_s1 + $0x48] sm:$0x3] }
0x1a43   :  { %v1714_v26 = vadd.f32 1.0, %v1713_v25 }
0x1a45   :  { %2914 = vrcp.f32 %v1714_v26 }
0x1a52   :  { %v2915_v30 = vpop.eup %2914 }
0x1a53   :  { %v1716_v12 = vmul.f32 %v2915_v30, %v1712_v28 }
0x1a55   :  { %v1717_v31 = vsub.f32 %v1707_v17, %v1716_v12 }
0x1a57   :  { %v1718_v32 = vpack.c.bf16 %v1717_v31, %v1717_v31 }
0x1a59   :  { %2746 = vmatmul.mubr.msk.bf16.vlgmr.msra.gmra.mxu0 %vm156_vm4, %v1718_v32 }
0x1a5a   :  { %2758 = vmatpush3.bf16.msra.mxu0 %v3092_v0  ;;  %2761 = vmatprep.mubr.msk.bf16.mxu0 %vm2974_vm1, %v2973_v3 }
0x1a5b   :  { %2759 = vmatprep.subr.bf16.mxu0 %v2973_v3 }
0x1a5e   :  { %2760 = vmatpush3.bf16.msra.mxu0 %v3102_v4 }
0x1a5f   :  { %2771 = vmatprep.subr.bf16.mxu0 %v2973_v3 }
0x1b19   :  { %v1756_v33 = vpop.f32.mrf.mxu0 }
0x1b1a   :  { %v1757_v34 = vadd.f32 %v3365_v20, %v1756_v33 }
0x1b1b   :  { %v2747_v35 = vpop.f32.mrf.mxu0 }
0x1b1c   :  { %v1762_v36 = vmin.f32 %v1757_v34, 20.0  ;;  %v1766_v47 = vmul.f32 2.0, %v1757_v34 }
0x1b1d   :  { %v1759_v38 = vpop.f32.mrf.mxu0 }
0x1b1e   :  { %v1763_v39 = vmul.f32 1.442695, %v1762_v36 }
0x1b1f   :  { %v2748_v40 = vpop.f32.mrf.mxu0 }
0x1b20   :  { %2916 = vpow2.f32 %v1763_v39 }
0x1b2d   :  { %v2917_v5 = vpop.eup %2916 }
0x1b2e   :  { %v1765_v43 = vadd.f32 1.0, %v2917_v5 }
0x1b30   :  { %v1767_v46 = vmul.f32 %v1765_v43, %v1765_v43 }
0x1b32   :  { %v1768_v29 = vadd.f32 1.0, %v1767_v46 }
0x1b34   :  { %2918 = vrcp.f32 %v1768_v29 }
0x1b41   :  { %v2919_v48 = vpop.eup %2918 }
0x1b42   :  { %v1770_v49 = vmul.f32 %v2919_v48, %v1766_v47 }
0x1b44   :  { %v1771_v50 = vsub.f32 %v1757_v34, %v1770_v49 }
0x1b46   :  { %v1772_v51 = vpack.c.bf16 %v1771_v50, %v1771_v50 }
0x1b48   :  { %2754 = vmatmul.mubr.msk.bf16.vlgmr.msra.gmra.mxu1 %vm156_vm4, %v1772_v51 }
0x1b49   :  { %2766 = vmatpush3.bf16.msra.mxu1 %v3014_v9  ;;  %2767 = vmatprep.mubr.msk.bf16.mxu1 %vm2974_vm1, %v2973_v3 }
0x1b4a   :  { %2779 = vmatprep.subr.bf16.mxu1 %v2973_v3 }
0x1c08   :  { %v1810_v52 = vpop.f32.mrf.mxu1 }
0x1c09   :  { %v1811_v53 = vadd.f32 %v3376_v37, %v1810_v52 }
0x1c0a   :  { %v2755_v54 = vpop.f32.mrf.mxu1 }
0x1c0b   :  { %v1816_v55 = vmin.f32 %v1811_v53, 20.0  ;;  %v1820_v63 = vmul.f32 2.0, %v1811_v53 }
0x1c0c   :  { %v1813_v7 = vpop.f32.mrf.mxu1 }
0x1c0d   :  { %v1817_v58 = vmul.f32 1.442695, %v1816_v55 }
0x1c0e   :  { %v2756_v42 = vpop.f32.mrf.mxu1 }
0x1c0f   :  { %2920 = vpow2.f32 %v1817_v58 }
0x1c1c   :  { %v2921_v59 = vpop.eup %2920 }
0x1c1d   :  { %v1819_v60 = vadd.f32 1.0, %v2921_v59 }
0x1c1f   :  { %v1821_v61 = vmul.f32 %v1819_v60, %v1819_v60 }
0x1c21   :  { %v1822_v62 = vadd.f32 1.0, %v1821_v61 }
0x1c23   :  { %2922 = vrcp.f32 %v1822_v62 }
0x1c30   :  { %v2923_v1 = vpop.eup %2922 }
0x1c31   :  { %v1824_v2 = vmul.f32 %v2923_v1, %v1820_v63 }
0x1c33   :  { %v1825_v6 = vsub.f32 %v1811_v53, %v1824_v2 }
0x1c35   :  { %v1826_v8 = vpack.c.bf16 %v1825_v6, %v1825_v6 }
0x1c37   :  { %2762 = vmatmul.mubr.msk.bf16.vlgmr.msra.gmra.mxu0 %vm156_vm4, %v1826_v8 }
0x1c38   :  { %2772 = vmatpush3.bf16.msra.mxu0 %v3032_v13  ;;  %2775 = vmatprep.mubr.msk.bf16.mxu0 %vm2974_vm1, %v2973_v3 }
0x1c39   :  { %2773 = vmatprep.subr.bf16.mxu0 %v2973_v3 }
0x1c3c   :  { %2774 = vmatpush3.bf16.msra.mxu0 %v3042_v16 }
0x1c3d   :  { %2787 = vmatprep.subr.bf16.mxu0 %v2973_v3 }
0x1cf7   :  { %v1864_v11 = vpop.f32.mrf.mxu0 }
0x1cf8   :  { %v1865_v56 = vadd.f32 %v3389_v27, %v1864_v11 }
0x1cf9   :  { %v2763_v14 = vpop.f32.mrf.mxu0 }
0x1cfa   :  { %v1871_v15 = vmul.f32 0.083488956, %v1865_v56 }
0x1cfb   :  { %v1867_v17 = vpop.f32.mrf.mxu0 }
0x1cfc   :  { %v1872_v19 = vsub.f32 %v1870_v57, %v1871_v15 }
0x1cfd   :  { %v2764_v21 = vpop.f32.mrf.mxu0 }
0x1cfe   :  { %v2393_v22 = vclamps-f32 %v1872_v19, 1.0 }
0x1d00   :  { %v1875_v23 = vmul.f32 0.65250605, %v2393_v22 }
0x1d02   :  { %v1877_v25 = vadd.f32 %v1876_v24, %v1875_v23 }
0x1d04   :  { %v3439_v26 = vadd.f32 %v1878_v45, %v1877_v25 }
0x1d06   :  { %v1881_v28 = vpack.c.bf16 %v3439_v26, %v3439_v26 }
0x1d08   :  { %2768 = vmatmul.mubr.msk.bf16.vlgmr.msra.gmra.mxu1 %vm92_vm3, %v1881_v28 }
0x1d09   :  { %2780 = vmatpush3.bf16.msra.mxu1 %v3061_v41  ;;  %2783 = vmatprep.mubr.msk.bf16.mxu1 %vm2974_vm1, %v2973_v3 }
0x1d0a   :  { %2781 = vmatprep.subr.bf16.mxu1 %v2973_v3 }
0x1d0d   :  { %2782 = vmatpush3.bf16.msra.mxu1 %v3071_v44 }
0x1d0e   :  { %2795 = vmatprep.subr.bf16.mxu1 %v2973_v3 }
0x1dc8   :  { %v1923_v30 = vpop.f32.mrf.mxu1 }
0x1dc9   :  { %v1924_v12 = vadd.f32 %v2394_v10, %v1923_v30  ;;  %v2092_v30 = vmul.f32 1.0012076, %v3439_v26 }
0x1dca   :  { %v2769_v31 = vpop.f32.mrf.mxu1 }
0x1dcb   :  { %v1929_v32 = vadd.f32 %v1924_v12, %v3049_v18 }
0x1dcc   :  { %v1926_v33 = vpop.f32.mrf.mxu1 }
0x1dcd   :  { %v1930_v34 = vmin.f32 %v1929_v32, 20.0  ;;  %v1934_v43 = vmul.f32 2.0, %v1929_v32 }
0x1dce   :  { %v2770_v35 = vpop.f32.mrf.mxu1 }
0x1dcf   :  { %v1931_v36 = vmul.f32 1.442695, %v1930_v34  ;;  %v2098_v35 = vmul.f32 0.0414374, %v3439_v26  ;;  %v2400_v26 = vld [vmem:[%s3514_s0] ss:$0 sm:$0xff] }
0x1dd1   :  { %2924 = vpow2.f32 %v1931_v36 }
0x1dde   :  { %v2925_v38 = vpop.eup %2924 }
0x1ddf   :  { %v1933_v39 = vadd.f32 1.0, %v2925_v38 }
0x1de1   :  { %v1935_v40 = vmul.f32 %v1933_v39, %v1933_v39 }
0x1de3   :  { %v1936_v5 = vadd.f32 1.0, %v1935_v40 }
0x1de5   :  { %2926 = vrcp.f32 %v1936_v5 }
0x1df2   :  { %v2927_v46 = vpop.eup %2926 }
0x1df3   :  { %v1938_v29 = vmul.f32 %v2927_v46, %v1934_v43 }
0x1df5   :  { %v1939_v47 = vsub.f32 %v1929_v32, %v1938_v29 }
0x1df7   :  { %v1940_v48 = vpack.c.bf16 %v1939_v47, %v1939_v47 }
0x1df9   :  { %2776 = vmatmul.mubr.msk.bf16.vlgmr.msra.gmra.mxu0 %vm156_vm4, %v1940_v48 }
0x1dfa   :  { %2788 = vmatpush3.bf16.msra.mxu0 %v3092_v0  ;;  %2791 = vmatprep.mubr.msk.bf16.mxu0 %vm2974_vm1, %v2973_v3 }
0x1dfb   :  { %2789 = vmatprep.subr.bf16.mxu0 %v2973_v3 }
0x1dfe   :  { %2790 = vmatpush3.bf16.msra.mxu0 %v3102_v4 }
0x1dff   :  { %2801 = vmatprep.subr.bf16.mxu0 %v2973_v3 }
0x1eb9   :  { %v1978_v49 = vpop.f32.mrf.mxu0 }
0x1eba   :  { %v1979_v50 = vadd.f32 %v3365_v20, %v1978_v49 }
0x1ebb   :  { %v2777_v51 = vpop.f32.mrf.mxu0 }
0x1ebc   :  { %v1984_v52 = vmin.f32 %v1979_v50, 20.0  ;;  %v1988_v60 = vmul.f32 2.0, %v1979_v50 }
0x1ebd   :  { %v1981_v53 = vpop.f32.mrf.mxu0 }
0x1ebe   :  { %v1985_v54 = vmul.f32 1.442695, %v1984_v52 }
0x1ebf   :  { %v2778_v55 = vpop.f32.mrf.mxu0 }
0x1ec0   :  { %2928 = vpow2.f32 %v1985_v54 }
0x1ecd   :  { %v2929_v7 = vpop.eup %2928 }
0x1ece   :  { %v1987_v58 = vadd.f32 1.0, %v2929_v7 }
0x1ed0   :  { %v1989_v42 = vmul.f32 %v1987_v58, %v1987_v58 }
0x1ed2   :  { %v1990_v59 = vadd.f32 1.0, %v1989_v42 }
0x1ed4   :  { %2930 = vrcp.f32 %v1990_v59 }
0x1ee1   :  { %v2931_v61 = vpop.eup %2930 }
0x1ee2   :  { %v1992_v62 = vmul.f32 %v2931_v61, %v1988_v60 }
0x1ee4   :  { %v1993_v63 = vsub.f32 %v1979_v50, %v1992_v62 }
0x1ee6   :  { %v1994_v1 = vpack.c.bf16 %v1993_v63, %v1993_v63 }
0x1ee8   :  { %2784 = vmatmul.mubr.msk.bf16.vlgmr.msra.gmra.mxu1 %vm156_vm4, %v1994_v1 }
0x1ee9   :  { %2796 = vmatpush3.bf16.msra.mxu1 %v3014_v9  ;;  %2797 = vmatprep.mubr.msk.bf16.mxu1 %vm2974_vm1, %v2973_v3 }
0x1eea   :  { %2809 = vmatprep.subr.bf16.mxu1 %v2973_v3 }
0x1fa8   :  { %v2032_v2 = vpop.f32.mrf.mxu1 }
0x1fa9   :  { %v2033_v6 = vadd.f32 %v3376_v37, %v2032_v2 }
0x1faa   :  { %v2785_v8 = vpop.f32.mrf.mxu1 }
0x1fab   :  { %v2038_v11 = vmin.f32 %v2033_v6, 20.0  ;;  %v2042_v9 = vmul.f32 2.0, %v2033_v6 }
0x1fac   :  { %v2035_v56 = vpop.f32.mrf.mxu1 }
0x1fad   :  { %v2039_v14 = vmul.f32 1.442695, %v2038_v11 }
0x1fae   :  { %v2786_v57 = vpop.f32.mrf.mxu1 }
0x1faf   :  { %2932 = vpow2.f32 %v2039_v14 }
0x1fbc   :  { %v2933_v15 = vpop.eup %2932 }
0x1fbd   :  { %v2041_v17 = vadd.f32 1.0, %v2933_v15 }
0x1fbf   :  { %v2043_v19 = vmul.f32 %v2041_v17, %v2041_v17 }
0x1fc1   :  { %v2044_v21 = vadd.f32 1.0, %v2043_v19 }
0x1fc3   :  { %2934 = vrcp.f32 %v2044_v21 }
0x1fd0   :  { %v2935_v22 = vpop.eup %2934 }
0x1fd1   :  { %v2046_v23 = vmul.f32 %v2935_v22, %v2042_v9 }
0x1fd3   :  { %v2047_v24 = vsub.f32 %v2033_v6, %v2046_v23 }
0x1fd5   :  { %v2048_v45 = vpack.c.bf16 %v2047_v24, %v2047_v24 }
0x1fd7   :  { %2792 = vmatmul.mubr.msk.bf16.vlgmr.msra.gmra.mxu0 %vm156_vm4, %v2048_v45 }
0x1fd8   :  { %2802 = vmatpush3.bf16.msra.mxu0 %v3032_v13  ;;  %2805 = vmatprep.mubr.msk.bf16.mxu0 %vm2974_vm1, %v2973_v3 }
0x1fd9   :  { %2803 = vmatprep.subr.bf16.mxu0 %v2973_v3 }
0x1fdc   :  { %2804 = vmatpush3.bf16.msra.mxu0 %v3042_v16  ;;  %v2100_v16 = vld [vmem:[%s3515_s1 + $0x50] sm:$0x3] }
0x1fdd   :  { %2817 = vmatprep.subr.bf16.mxu0 %v2973_v3 }
0x2097   :  { %v2086_v25 = vpop.f32.mrf.mxu0 }
0x2098   :  { %v2087_v28 = vadd.f32 %v3389_v27, %v2086_v25 }
0x2099   :  { %v2793_v10 = vpop.f32.mrf.mxu0 }
0x209a   :  { %v2093_v12 = vmul.f32 0.049160246, %v2087_v28 }
0x209b   :  { %v2089_v31 = vpop.f32.mrf.mxu0 }
0x209c   :  { %v2094_v32 = vsub.f32 %v2092_v30, %v2093_v12 }
0x209d   :  { %v2794_v33 = vpop.f32.mrf.mxu0 }
0x209e   :  { %v2399_v13 = vclamps-f32 %v2094_v32, 1.0 }
0x20a0   :  { %v2097_v34 = vmul.f32 0.9585659, %v2399_v13 }
0x20a2   :  { %v2099_v36 = vadd.f32 %v2098_v35, %v2097_v34 }
0x20a4   :  { %v3481_v38 = vadd.f32 %v2100_v16, %v2099_v36 }
0x20a6   :  { %v2103_v39 = vpack.c.bf16 %v3481_v38, %v3481_v38  ;;  %v2314_v31 = vmul.f32 1.00005, %v3481_v38  ;;  %v2320_v36 = vmul.f32 0.0, %v3481_v38 }
0x20a8   :  { %2798 = vmatmul.mubr.msk.bf16.vlgmr.msra.gmra.mxu1 %vm92_vm3, %v2103_v39  ;;  %v2322_v39 = vld [vmem:[%s3515_s1 + $0x58] sm:$0x3] }
0x20a9   :  { %2810 = vmatpush3.bf16.msra.mxu1 %v3061_v41  ;;  %2813 = vmatprep.mubr.msk.bf16.mxu1 %vm2974_vm1, %v2973_v3 }
0x20aa   :  { %2811 = vmatprep.subr.bf16.mxu1 %v2973_v3 }
0x20ad   :  { %2812 = vmatpush3.bf16.msra.mxu1 %v3071_v44 }
0x2168   :  { %v2145_v40 = vpop.f32.mrf.mxu1 }
0x2169   :  { %v2146_v5 = vadd.f32 %v2400_v26, %v2145_v40 }
0x216a   :  { %v2799_v43 = vpop.f32.mrf.mxu1 }
0x216b   :  { %v2151_v46 = vadd.f32 %v2146_v5, %v3049_v18 }
0x216c   :  { %v2148_v29 = vpop.f32.mrf.mxu1 }
0x216d   :  { %v2152_v47 = vmin.f32 %v2151_v46, 20.0  ;;  %v2156_v44 = vmul.f32 2.0, %v2151_v46 }
0x216e   :  { %v2800_v48 = vpop.f32.mrf.mxu1 }
0x216f   :  { %v2153_v41 = vmul.f32 1.442695, %v2152_v47 }
0x2171   :  { %2936 = vpow2.f32 %v2153_v41 }
0x217e   :  { %v2937_v49 = vpop.eup %2936 }
0x217f   :  { %v2155_v50 = vadd.f32 1.0, %v2937_v49 }
0x2181   :  { %v2157_v51 = vmul.f32 %v2155_v50, %v2155_v50 }
0x2183   :  { %v2158_v52 = vadd.f32 1.0, %v2157_v51 }
0x2185   :  { %2938 = vrcp.f32 %v2158_v52 }
0x2192   :  { %v2939_v53 = vpop.eup %2938 }
0x2193   :  { %v2160_v54 = vmul.f32 %v2939_v53, %v2156_v44 }
0x2195   :  { %v2161_v55 = vsub.f32 %v2151_v46, %v2160_v54 }
0x2197   :  { %v2162_v7 = vpack.c.bf16 %v2161_v55, %v2161_v55 }
0x2199   :  { %2806 = vmatmul.mubr.msk.bf16.vlgmr.msra.gmra.mxu0 %vm156_vm4, %v2162_v7 }
0x219a   :  { %2818 = vmatpush3.bf16.msra.mxu0 %v3092_v0  ;;  %2821 = vmatprep.mubr.msk.bf16.mxu0 %vm2974_vm1, %v2973_v3 }
0x219b   :  { %2819 = vmatprep.subr.bf16.mxu0 %v2973_v3 }
0x219e   :  { %2820 = vmatpush3.bf16.msra.mxu0 %v3102_v4 }
0x2259   :  { %v2200_v18 = vpop.f32.mrf.mxu0 }
0x225a   :  { %v2201_v58 = vadd.f32 %v3365_v20, %v2200_v18 }
0x225b   :  { %v2807_v42 = vpop.f32.mrf.mxu0 }
0x225c   :  { %v2206_v59 = vmin.f32 %v2201_v58, 20.0  ;;  %v2210_v6 = vmul.f32 2.0, %v2201_v58 }
0x225d   :  { %v2203_v60 = vpop.f32.mrf.mxu0 }
0x225e   :  { %v2207_v61 = vmul.f32 1.442695, %v2206_v59 }
0x225f   :  { %v2808_v62 = vpop.f32.mrf.mxu0 }
0x2260   :  { %2940 = vpow2.f32 %v2207_v61 }
0x226d   :  { %v2941_v63 = vpop.eup %2940 }
0x226e   :  { %v2209_v1 = vadd.f32 1.0, %v2941_v63 }
0x2270   :  { %v2211_v2 = vmul.f32 %v2209_v1, %v2209_v1 }
0x2272   :  { %v2212_v0 = vadd.f32 1.0, %v2211_v2 }
0x2274   :  { %2942 = vrcp.f32 %v2212_v0 }
0x2281   :  { %v2943_v8 = vpop.eup %2942 }
0x2282   :  { %v2214_v11 = vmul.f32 %v2943_v8, %v2210_v6 }
0x2284   :  { %v2215_v3 = vsub.f32 %v2201_v58, %v2214_v11 }
0x2286   :  { %v2216_v56 = vpack.c.bf16 %v2215_v3, %v2215_v3 }
0x2288   :  { %2814 = vmatmul.mubr.msk.bf16.vlgmr.msra.gmra.mxu1 %vm156_vm4, %v2216_v56 }
0x2348   :  { %v2254_v4 = vpop.f32.mrf.mxu1 }
0x2349   :  { %v2255_v20 = vadd.f32 %v3376_v37, %v2254_v4 }
0x234a   :  { %v2815_v14 = vpop.f32.mrf.mxu1 }
0x234b   :  { %v2260_v57 = vmin.f32 %v2255_v20, 20.0  ;;  %v2264_v24 = vmul.f32 2.0, %v2255_v20 }
0x234c   :  { %v2257_v15 = vpop.f32.mrf.mxu1 }
0x234d   :  { %v2261_v17 = vmul.f32 1.442695, %v2260_v57 }
0x234e   :  { %v2816_v19 = vpop.f32.mrf.mxu1 }
0x234f   :  { %2944 = vpow2.f32 %v2261_v17 }
0x235c   :  { %v2945_v21 = vpop.eup %2944 }
0x235d   :  { %v2263_v9 = vadd.f32 1.0, %v2945_v21 }
0x235f   :  { %v2265_v22 = vmul.f32 %v2263_v9, %v2263_v9 }
0x2361   :  { %v2266_v23 = vadd.f32 1.0, %v2265_v22 }
0x2363   :  { %2946 = vrcp.f32 %v2266_v23 }
0x2370   :  { %v2947_v45 = vpop.eup %2946 }
0x2371   :  { %v2268_v25 = vmul.f32 %v2947_v45, %v2264_v24 }
0x2373   :  { %v2269_v28 = vsub.f32 %v2255_v20, %v2268_v25 }
0x2375   :  { %v2270_v10 = vpack.c.bf16 %v2269_v28, %v2269_v28 }
0x2377   :  { %2822 = vmatmul.mubr.msk.bf16.vlgmr.msra.gmra.mxu0 %vm156_vm4, %v2270_v10 }
0x2437   :  { %v2308_v30 = vpop.f32.mrf.mxu0 }
0x2438   :  { %v2309_v37 = vadd.f32 %v3389_v27, %v2308_v30 }
0x2439   :  { %v2823_v12 = vpop.f32.mrf.mxu0 }
0x243a   :  { %v2315_v32 = vmul.f32 0.01000083, %v2309_v37 }
0x243b   :  { %v2311_v33 = vpop.f32.mrf.mxu0 }
0x243c   :  { %v2316_v13 = vsub.f32 %v2314_v31, %v2315_v32 }
0x243d   :  { %v2824_v34 = vpop.f32.mrf.mxu0 }
0x243e   :  { %v2405_v35 = vclamps-f32 %v2316_v13, 1.0 }
0x2440   :  { %v2319_v16 = vmul.f32 0.99983406, %v2405_v35 }
0x2442   :  { %v2321_v26 = vadd.f32 %v2320_v36, %v2319_v16 }
0x2444   :  { %v2323_v40 = vadd.f32 %v2322_v39, %v2321_v26 }
0x2446   :  { %v2406_v27 = vclamps-f32 %v2323_v40, 1.0 }
0x2448   :  { %2327 = vst.msk [vmem:[#allocation2] sm:$0x3] %vm2326_vm5, %v2406_v27 }
0x2449   :  { %2962 = shalt.err (!%p2959_p4)
}
0x244a   :  { %2337 = dma.vmem_to_hbm [thread:$0]  %s2335_s11, 32, %s3516_s2, [#allocation3]  }
0x244b   :  { %2971 = dma.done.wait [#allocation3], 32  }
0x244c   :  { %2972 = vsyncadd [#allocation3], 4294967264 }
0x244d   :  { %2341 = vsyncpa [#allocation3], 1 }

</bundles_post_ra>
